<compile_context>
chip_gen: v7x
topology: tpu7x:2x2x1
jax: 0.10.0
libtpu: 0.0.40
codegen_flags: <defaults>
</compile_context>

<pallas_src>
import functools

import jax
import jax.numpy as jnp
from jax.experimental import pallas as pl
from jax.experimental.pallas import tpu as pltpu


# ----------------------------------------------------------------------------- kernel


def _b2s_attention_kernel(x_ref, m_row_ref, m_col_ref, wqkv_ref, bqkv_ref,
                          wproj_ref, bproj_ref, o_ref,
                          keep_ref, ctx_hm_ref, ctx_flat_ref,
                          *, num_heads, batch_block, compute_dtype):
    M, C = x_ref.shape                      # M = batch_block * N flattened sequence rows
    bb = batch_block
    N = M // bb
    D = C // num_heads
    cd = compute_dtype
    exact_f32 = jnp.dtype(cd) == jnp.dtype(jnp.float32)

    # ---- keep[i, j] = 0 iff (m[j] == 1 and m[i] == 0), else 1 -- once per batch element ----
    for bi in range(bb):
        mj = m_row_ref[bi]                  # (1, N): m[j] along lanes
        mi = m_col_ref[bi]                  # (N, 1): m[i] along sublanes
        keep_ref[bi] = 1.0 - jnp.logical_and(mj >= 0.5, mi < 0.5).astype(jnp.float32)

    # ---- per-head QKV projection + attention; context written head-major ----
    def head_body(h, carry):
        # (M, C) @ (C, 3D): full-C contraction on the MXU, f32 accumulate.
        qkv_h = jnp.dot(x_ref[...], wqkv_ref[h],
                        preferred_element_type=jnp.float32) + bqkv_ref[h]      # (M, 3D)
        q = qkv_h[:, 0:D].astype(cd)
        k = qkv_h[:, D:2 * D].astype(cd)
        v = qkv_h[:, 2 * D:3 * D].astype(cd)
        for bi in range(bb):                # static; bb kept small by the wrapper
            r0 = bi * N
            qh, kh, vh = q[r0:r0 + N], k[r0:r0 + N], v[r0:r0 + N]
            # q @ k^T (no 1/sqrt(D) scale in the original module)
            attn = jax.lax.dot_general(qh, kh, (((1,), (1,)), ((), ())),
                                       preferred_element_type=jnp.float32)     # (N, N)
            attn = attn * keep_ref[bi]                       # multiplicative logit gate
            attn = attn - jnp.max(attn, axis=-1, keepdims=True)
            e = jnp.exp(attn)
            denom = jnp.sum(e, axis=-1, keepdims=True)
            p = e * pl.reciprocal(denom, approx=not exact_f32)  # EUP slot on the fast path
            # attn_drop has rate 0.0 -> identity.
            ctx = jnp.dot(p.astype(cd), vh, preferred_element_type=jnp.float32)  # (N, D)
            ctx_hm_ref[h, bi] = ctx.astype(cd)
        return carry

    jax.lax.fori_loop(0, num_heads, head_body, 0,
                      unroll=(num_heads * bb <= 8))

    # ---- merge head-major context -> (M, C) once; single (M, C) @ (C, C) projection ----
    for h in range(num_heads):
        for bi in range(bb):
            ctx_flat_ref[bi * N:(bi + 1) * N, h * D:(h + 1) * D] = ctx_hm_ref[h, bi]

    out = jnp.dot(ctx_flat_ref[...], wproj_ref[...], preferred_element_type=jnp.float32)
    # proj_drop has rate 0.0 -> identity.
    o_ref[...] = (out + bproj_ref[...]).astype(o_ref.dtype)


# ----------------------------------------------------------------------------- sizing


def _pad(v, m):
    return pl.cdiv(v, m) * m


def _default_vmem_budget():
    """~45% of per-core VMEM; falls back to the v7x 64 MiB floor if the query fails."""
    try:
        cap = int(pltpu.get_tpu_info().vmem_capacity_bytes)
    except Exception:
        cap = 64 * 1024 * 1024
    return int(cap * 0.45)


def _vmem_estimate(bb, N, C, num_heads, itemsize):
    """Rough per-step VMEM footprint (pipeline buffers + scratch + transients), bytes."""
    M = bb * N
    D = C // num_heads
    c_l, n_l, d3_l, d_l = _pad(C, 128), _pad(N, 128), _pad(3 * D, 128), _pad(D, 128)
    est = 0
    # double-buffered pipeline blocks
    est += 2 * _pad(M, 8) * c_l * itemsize                    # x block
    est += 2 * _pad(M, 8) * c_l * 4                           # out block (f32)
    est += 2 * num_heads * _pad(C, 8) * d3_l * itemsize       # head-major QKV weights
    est += 2 * _pad(C, 8) * c_l * itemsize                    # proj weights
    est += 2 * num_heads * 8 * d3_l * 4 + 2 * 8 * c_l * 4     # biases
    est += 2 * bb * 8 * n_l * 4 + 2 * bb * _pad(N, 8) * 128 * 4   # mask row / col blocks
    # scratch
    est += bb * _pad(N, 8) * n_l * 4                          # keep masks
    est += num_heads * bb * _pad(N, 8) * d_l * itemsize       # head-major context
    est += _pad(M, 8) * c_l * itemsize                        # merged context
    # transients inside one head iteration (qkv_h f32, attn / e / p f32)
    est += _pad(M, 8) * d3_l * 4 + 3 * _pad(N, 8) * n_l * 4
    return est


def _pick_batch_block(B, N, C, num_heads, compute_dtype, vmem_budget_bytes,
                      row_target=512):
    """Largest divisor of B that (a) keeps the parallel grid axis extent >= 2 when B >= 2
    (v7x megacore), (b) keeps the per-step LHS at <= row_target rows, (c) fits VMEM."""
    itemsize = jnp.dtype(compute_dtype).itemsize
    cap = max(1, B // 2)
    best = 1
    for bb in range(1, cap + 1):
        if B % bb != 0:
            continue
        if bb > 1 and bb * N > row_target:
            continue
        if bb > 1 and _vmem_estimate(bb, N, C, num_heads, itemsize) > vmem_budget_bytes:
            continue
        best = bb
    return best


# ----------------------------------------------------------------------------- wrapper


def b2s_attention_forward(x, mask, params, num_heads, *,
                          compute_dtype=jnp.bfloat16, batch_block=None,
                          vmem_budget_bytes=None):
    B, N, C = x.shape
    assert C % num_heads == 0
    D = C // num_heads
    cd = compute_dtype
    wq, bq, wk, bk, wv, bv, wp, bp = params

    # ---- head-major fused QKV weights: (H, C, 3D), columns ordered [q_h | k_h | v_h] ----
    wq_h = wq.reshape(C, num_heads, D)
    wk_h = wk.reshape(C, num_heads, D)
    wv_h = wv.reshape(C, num_heads, D)
    w_qkv_hm = jnp.stack([wq_h, wk_h, wv_h], axis=2)                 # (C, H, 3, D)
    w_qkv_hm = w_qkv_hm.transpose(1, 0, 2, 3).reshape(num_heads, C, 3 * D).astype(cd)
    b_qkv_hm = jnp.stack([bq.reshape(num_heads, D), bk.reshape(num_heads, D),
                          bv.reshape(num_heads, D)], axis=1)         # (H, 3, D)
    b_qkv_hm = b_qkv_hm.reshape(num_heads, 1, 3 * D).astype(jnp.float32)
    w_proj = wp.astype(cd)                                           # (C, C)
    b_proj = bp.reshape(1, C).astype(jnp.float32)

    # ---- mask preprocessing (glue): binarize (>=1 -> 1), channel 0, flatten HW ----
    m_bin = (mask >= 1.0).astype(jnp.float32)                        # (B, Cm, H, W)
    m_flat = m_bin[:, 0, :, :].reshape(B, N)                         # (B, N)
    m_row = m_flat.reshape(B, 1, N)
    # NOTE: column form kept as an explicit (tiny) input for lowering robustness,
    # rather than transposing the row form on the XLU in-kernel.
    m_col = m_flat.reshape(B, N, 1)

    if vmem_budget_bytes is None:
        vmem_budget_bytes = _default_vmem_budget()
    if batch_block is None:
        batch_block = _pick_batch_block(B, N, C, num_heads, cd, vmem_budget_bytes)
    bb = batch_block
    assert B % bb == 0
    M = bb * N
    assert M % 8 == 0 or bb == B, "batch_block * N must be a multiple of 8"

    # Pre-cast x to compute_dtype: halves HBM->VMEM bytes for x on the bf16 path.
    x2 = x.reshape(B * N, C).astype(cd)

    est = _vmem_estimate(bb, N, C, num_heads, jnp.dtype(cd).itemsize)
    vmem_limit = int(min(max(est * 3 // 2, 32 * 1024 * 1024), 64 * 1024 * 1024))

    flops = 2 * B * N * C * 4 * C + 4 * B * N * N * C
    bytes_accessed = (int(x2.size) * x2.dtype.itemsize            # x in
                      + B * N * C * x.dtype.itemsize              # out
                      + int(w_qkv_hm.size) * w_qkv_hm.dtype.itemsize
                      + int(w_proj.size) * w_proj.dtype.itemsize
                      + int(b_qkv_hm.size) * 4 + int(b_proj.size) * 4
                      + 2 * B * N * 4)                            # mask row/col
    cost = pl.CostEstimate(flops=int(flops),
                           transcendentals=int(B * num_heads * N * N),
                           bytes_accessed=int(bytes_accessed))

    kernel = functools.partial(_b2s_attention_kernel, num_heads=num_heads,
                               batch_block=bb, compute_dtype=cd)

    out2 = pl.pallas_call(
        kernel,
        out_shape=jax.ShapeDtypeStruct((B * N, C), x.dtype),
        grid_spec=pltpu.PrefetchScalarGridSpec(
            num_scalar_prefetch=0,
            grid=(B // bb,),
            in_specs=[
                pl.BlockSpec((M, C), lambda i: (i, 0)),                    # x rows
                pl.BlockSpec((bb, 1, N), lambda i: (i, 0, 0)),             # mask, row form
                pl.BlockSpec((bb, N, 1), lambda i: (i, 0, 0)),             # mask, col form
                pl.BlockSpec((num_heads, C, 3 * D), lambda i: (0, 0, 0)),  # head-major QKV W
                pl.BlockSpec((num_heads, 1, 3 * D), lambda i: (0, 0, 0)),  # head-major QKV b
                pl.BlockSpec((C, C), lambda i: (0, 0)),                    # proj W
                pl.BlockSpec((1, C), lambda i: (0, 0)),                    # proj b
            ],
            out_specs=pl.BlockSpec((M, C), lambda i: (i, 0)),
            scratch_shapes=[
                pltpu.VMEM((bb, N, N), jnp.float32),           # keep masks (f32 gate math)
                pltpu.VMEM((num_heads, bb, N, D), cd),         # head-major context
                pltpu.VMEM((M, C), cd),                        # merged context -> proj matmul
            ],
        ),
        compiler_params=pltpu.CompilerParams(
            dimension_semantics=("parallel",),                 # batch-block axis (megacore)
            vmem_limit_bytes=vmem_limit),
        cost_estimate=cost,
    )(x2, m_row, m_col, w_qkv_hm, b_qkv_hm, w_proj, b_proj)
    return out2.reshape(B, N, C)


# ----------------------------------------------------------------------------- reference


def reference_forward(x, mask, params, num_heads):
    """Pure-JAX f32 reference mirroring the PyTorch forward exactly."""
    B, N, C = x.shape
    D = C // num_heads
    wq, bq, wk, bk, wv, bv, wp, bp = params
    q = (x @ wq + bq).reshape(B, N, num_heads, D).transpose(0, 2, 1, 3)
    k = (x @ wk + bk).reshape(B, N, num_heads, D).transpose(0, 2, 1, 3)
    v = (x @ wv + bv).reshape(B, N, num_heads, D).transpose(0, 2, 1, 3)
    m_bin = (mask >= 1.0).astype(jnp.float32)
    m_flat = m_bin[:, 0, :, :].reshape(B, N)
    keep = 1.0 - (jnp.logical_and(m_flat[:, None, :] == 1.0,
                                  m_flat[:, :, None] == 0.0)).astype(jnp.float32)
    attn = jnp.einsum('bhnd,bhmd->bhnm', q, k) * keep[:, None, :, :]
    attn = jax.nn.softmax(attn, axis=-1)
    ctx = jnp.einsum('bhnm,bhmd->bhnd', attn, v).transpose(0, 2, 1, 3).reshape(B, N, C)
    return ctx @ wp + bp


# ----------------------------------------------------------------------------- demo / test


if __name__ == "__main__":
    key = jax.random.PRNGKey(0)
    B, Hs, Ws = 2, 8, 8
    N = Hs * Ws
    dim, num_heads = 32, 4
    Cm = 3                                                   # mask channels (channel 0 used)

    ks = jax.random.split(key, 10)
    x = jax.random.normal(ks[0], (B, N, dim), jnp.float32)
    mask = jax.random.uniform(ks[1], (B, Cm, Hs, Ws), jnp.float32) * 2.0   # values in [0, 2)

    scale = 1.0 / (dim ** 0.5)
    wq = jax.random.normal(ks[2], (dim, dim), jnp.float32) * scale
    wk = jax.random.normal(ks[3], (dim, dim), jnp.float32) * scale
    wv = jax.random.normal(ks[4], (dim, dim), jnp.float32) * scale
    wp = jax.random.normal(ks[5], (dim, dim), jnp.float32) * scale
    bq = jax.random.normal(ks[6], (dim,), jnp.float32) * 0.1
    bk = jax.random.normal(ks[7], (dim,), jnp.float32) * 0.1
    bv = jax.random.normal(ks[8], (dim,), jnp.float32) * 0.1
    bp = jax.random.normal(ks[9], (dim,), jnp.float32) * 0.1
    params = (wq, bq, wk, bk, wv, bv, wp, bp)

    ref = reference_forward(x, mask, params, num_heads)

    # f32 matmul operands + exact reciprocal: tight check against module semantics.
    out_f32 = jax.block_until_ready(
        b2s_attention_forward(x, mask, params, num_heads, compute_dtype=jnp.float32))
    assert out_f32.shape == (B, N, dim)
    assert jnp.allclose(out_f32, ref, atol=1e-2, rtol=1e-2), "f32 kernel/reference mismatch"

    # Default fast path (bf16 operands / scratch, f32 accumulate & softmax): loose sanity check.
    out_bf16 = jax.block_until_ready(b2s_attention_forward(x, mask, params, num_heads))
    assert out_bf16.shape == (B, N, dim)
    assert jnp.allclose(out_bf16, ref, atol=1.5e-1, rtol=1e-1), "bf16 kernel sanity mismatch"

    print("KERNEL_OK")
</pallas_src>

<mosaic_0001>
module attributes {stable_mosaic.version = 11 : i64} {
  func.func @_b2s_attention_kernel(%arg0: i32, %arg1: memref<64x32xf32, #tpu.memory_space<vmem>>, %arg2: memref<1x1x64xf32, #tpu.memory_space<vmem>>, %arg3: memref<1x64x1xf32, #tpu.memory_space<vmem>>, %arg4: memref<4x32x24xf32, #tpu.memory_space<vmem>>, %arg5: memref<4x1x24xf32, #tpu.memory_space<vmem>>, %arg6: memref<32x32xf32, #tpu.memory_space<vmem>>, %arg7: memref<1x32xf32, #tpu.memory_space<vmem>>, %arg8: memref<64x32xf32, #tpu.memory_space<vmem>>, %arg9: memref<1x64x64xf32, #tpu.memory_space<vmem>>, %arg10: memref<4x1x64x8xf32, #tpu.memory_space<vmem>>, %arg11: memref<64x32xf32, #tpu.memory_space<vmem>>) attributes {dimension_semantics = [#tpu.dimension_semantics<parallel>], iteration_bounds = array<i64: 2>, scalar_prefetch = 0 : i64, scratch_operands = 3 : i64, tpu.core_type = #tpu.core_type<tc>, window_params = [{transform_indices = @transform_0, window_bounds = array<i64: 64, 32>}, {transform_indices = @transform_1, window_bounds = array<i64: 1, 1, 64>}, {transform_indices = @transform_2, window_bounds = array<i64: 1, 64, 1>}, {pipeline_mode = #tpu.pipeline_mode<synchronous>, transform_indices = @transform_3, window_bounds = array<i64: 4, 32, 24>}, {pipeline_mode = #tpu.pipeline_mode<synchronous>, transform_indices = @transform_4, window_bounds = array<i64: 4, 1, 24>}, {pipeline_mode = #tpu.pipeline_mode<synchronous>, transform_indices = @transform_5, window_bounds = array<i64: 32, 32>}, {pipeline_mode = #tpu.pipeline_mode<synchronous>, transform_indices = @transform_6, window_bounds = array<i64: 1, 32>}, {transform_indices = @transform_7, window_bounds = array<i64: 64, 32>}]} {
    %c0 = arith.constant 0 : index
    %c0_0 = arith.constant 0 : index
    %c0_1 = arith.constant 0 : index
    %0 = vector.load %arg2[%c0, %c0_0, %c0_1] : memref<1x1x64xf32, #tpu.memory_space<vmem>>, vector<1x1x64xf32>
    %1 = vector.shape_cast %0 : vector<1x1x64xf32> to vector<1x64xf32>
    %c0_2 = arith.constant 0 : index
    %c0_3 = arith.constant 0 : index
    %c0_4 = arith.constant 0 : index
    %2 = vector.load %arg3[%c0_2, %c0_3, %c0_4] : memref<1x64x1xf32, #tpu.memory_space<vmem>>, vector<1x64x1xf32>
    %3 = vector.shape_cast %2 : vector<1x64x1xf32> to vector<64x1xf32>
    %cst = arith.constant 5.000000e-01 : f32
    %4 = vector.broadcast %cst : f32 to vector<1x64xf32>
    %5 = arith.cmpf oge, %1, %4 : vector<1x64xf32>
    %cst_5 = arith.constant 5.000000e-01 : f32
    %6 = vector.broadcast %cst_5 : f32 to vector<64x1xf32>
    %7 = arith.cmpf olt, %3, %6 : vector<64x1xf32>
    %8 = vector.broadcast %5 : vector<1x64xi1> to vector<64x64xi1>
    %9 = vector.broadcast %7 : vector<64x1xi1> to vector<64x64xi1>
    %10 = arith.andi %8, %9 : vector<64x64xi1>
    %11 = arith.extui %10 : vector<64x64xi1> to vector<64x64xi32>
    %12 = arith.sitofp %11 : vector<64x64xi32> to vector<64x64xf32>
    %cst_6 = arith.constant 1.000000e+00 : f32
    %13 = vector.broadcast %cst_6 : f32 to vector<64x64xf32>
    %14 = arith.subf %13, %12 : vector<64x64xf32>
    %c0_7 = arith.constant 0 : index
    %c0_8 = arith.constant 0 : index
    %c0_9 = arith.constant 0 : index
    %15 = vector.load %arg9[%c0_7, %c0_8, %c0_9] : memref<1x64x64xf32, #tpu.memory_space<vmem>>, vector<1x64x64xf32>
    %16 = vector.shape_cast %15 : vector<1x64x64xf32> to vector<64x64xf32>
    %17 = vector.shape_cast %14 : vector<64x64xf32> to vector<1x64x64xf32>
    tpu.vector_store %arg9[%c0_7, %c0_8, %c0_9], %17 {strides = array<i32>} : memref<1x64x64xf32, #tpu.memory_space<vmem>>, vector<1x64x64xf32>,
    %c0_i32 = arith.constant 0 : i32
    %c0_10 = arith.constant 0 : index
    %c0_11 = arith.constant 0 : index
    %18 = vector.load %arg1[%c0_10, %c0_11] : memref<64x32xf32, #tpu.memory_space<vmem>>, vector<64x32xf32>
    %19 = arith.index_cast %c0_i32 : i32 to index
    %c0_12 = arith.constant 0 : index
    %c0_13 = arith.constant 0 : index
    %20 = vector.load %arg4[%19, %c0_12, %c0_13] : memref<4x32x24xf32, #tpu.memory_space<vmem>>, vector<1x32x24xf32>
    %21 = vector.shape_cast %20 : vector<1x32x24xf32> to vector<32x24xf32>
    %cst_14 = arith.constant dense<0.000000e+00> : vector<64x24xf32>
    %22 = tpu.matmul %18, %21, %cst_14 {dimension_numbers = #tpu.dot_dimension_numbers<[1], [0], [0], [1], [0, 0, 1, 1], [], []>} : vector<64x32xf32>, vector<32x24xf32>, vector<64x24xf32> -> vector<64x24xf32>
    %23 = arith.index_cast %c0_i32 : i32 to index
    %c0_15 = arith.constant 0 : index
    %c0_16 = arith.constant 0 : index
    %24 = vector.load %arg5[%23, %c0_15, %c0_16] : memref<4x1x24xf32, #tpu.memory_space<vmem>>, vector<1x1x24xf32>
    %25 = vector.shape_cast %24 : vector<1x1x24xf32> to vector<1x24xf32>
    %26 = vector.broadcast %25 : vector<1x24xf32> to vector<64x24xf32>
    %27 = arith.addf %22, %26 : vector<64x24xf32>
    %28 = vector.extract_strided_slice %27 {offsets = [0, 0], sizes = [64, 8], strides = [1, 1]} : vector<64x24xf32> to vector<64x8xf32>
    %29 = vector.extract_strided_slice %27 {offsets = [0, 8], sizes = [64, 8], strides = [1, 1]} : vector<64x24xf32> to vector<64x8xf32>
    %30 = vector.extract_strided_slice %27 {offsets = [0, 16], sizes = [64, 8], strides = [1, 1]} : vector<64x24xf32> to vector<64x8xf32>
    %cst_17 = arith.constant dense<0.000000e+00> : vector<64x64xf32>
    %31 = tpu.matmul %28, %29, %cst_17 {dimension_numbers = #tpu.dot_dimension_numbers<[1], [1], [0], [0], [0, 0, 1, 0], [], []>} : vector<64x8xf32>, vector<64x8xf32>, vector<64x64xf32> -> vector<64x64xf32>
    %c0_18 = arith.constant 0 : index
    %c0_19 = arith.constant 0 : index
    %c0_20 = arith.constant 0 : index
    %32 = vector.load %arg9[%c0_18, %c0_19, %c0_20] : memref<1x64x64xf32, #tpu.memory_space<vmem>>, vector<1x64x64xf32>
    %33 = vector.shape_cast %32 : vector<1x64x64xf32> to vector<64x64xf32>
    %34 = arith.mulf %31, %33 : vector<64x64xf32>
    %cst_21 = arith.constant dense<0xFF800000> : vector<64xf32>
    %35 = vector.multi_reduction <maximumf>, %34, %cst_21 [1] : vector<64x64xf32> to vector<64xf32>
    %36 = vector.shape_cast %35 : vector<64xf32> to vector<64x1xf32>
    %37 = vector.broadcast %36 : vector<64x1xf32> to vector<64x64xf32>
    %38 = arith.subf %34, %37 : vector<64x64xf32>
    %39 = math.exp %38 : vector<64x64xf32>
    %cst_22 = arith.constant dense<0.000000e+00> : vector<64xf32>
    %40 = vector.multi_reduction <add>, %39, %cst_22 [1] : vector<64x64xf32> to vector<64xf32>
    %41 = vector.shape_cast %40 : vector<64xf32> to vector<64x1xf32>
    %42 = tpu.reciprocal %41 : vector<64x1xf32> -> vector<64x1xf32>
    %43 = vector.broadcast %42 : vector<64x1xf32> to vector<64x64xf32>
    %44 = arith.mulf %39, %43 : vector<64x64xf32>
    %cst_23 = arith.constant dense<0.000000e+00> : vector<64x8xf32>
    %45 = tpu.matmul %44, %30, %cst_23 {dimension_numbers = #tpu.dot_dimension_numbers<[1], [0], [0], [1], [0, 0, 1, 1], [], []>} : vector<64x64xf32>, vector<64x8xf32>, vector<64x8xf32> -> vector<64x8xf32>
    %46 = arith.index_cast %c0_i32 : i32 to index
    %c0_24 = arith.constant 0 : index
    %c0_25 = arith.constant 0 : index
    %c0_26 = arith.constant 0 : index
    %47 = vector.load %arg10[%46, %c0_24, %c0_25, %c0_26] : memref<4x1x64x8xf32, #tpu.memory_space<vmem>>, vector<1x1x64x8xf32>
    %48 = vector.shape_cast %47 : vector<1x1x64x8xf32> to vector<64x8xf32>
    %49 = vector.shape_cast %45 : vector<64x8xf32> to vector<1x1x64x8xf32>
    tpu.vector_store %arg10[%46, %c0_24, %c0_25, %c0_26], %49 {strides = array<i32>} : memref<4x1x64x8xf32, #tpu.memory_space<vmem>>, vector<1x1x64x8xf32>,
    %c1_i32 = arith.constant 1 : i32
    %c0_27 = arith.constant 0 : index
    %c0_28 = arith.constant 0 : index
    %50 = vector.load %arg1[%c0_27, %c0_28] : memref<64x32xf32, #tpu.memory_space<vmem>>, vector<64x32xf32>
    %51 = arith.index_cast %c1_i32 : i32 to index
    %c0_29 = arith.constant 0 : index
    %c0_30 = arith.constant 0 : index
    %52 = vector.load %arg4[%51, %c0_29, %c0_30] : memref<4x32x24xf32, #tpu.memory_space<vmem>>, vector<1x32x24xf32>
    %53 = vector.shape_cast %52 : vector<1x32x24xf32> to vector<32x24xf32>
    %cst_31 = arith.constant dense<0.000000e+00> : vector<64x24xf32>
    %54 = tpu.matmul %50, %53, %cst_31 {dimension_numbers = #tpu.dot_dimension_numbers<[1], [0], [0], [1], [0, 0, 1, 1], [], []>} : vector<64x32xf32>, vector<32x24xf32>, vector<64x24xf32> -> vector<64x24xf32>
    %55 = arith.index_cast %c1_i32 : i32 to index
    %c0_32 = arith.constant 0 : index
    %c0_33 = arith.constant 0 : index
    %56 = vector.load %arg5[%55, %c0_32, %c0_33] : memref<4x1x24xf32, #tpu.memory_space<vmem>>, vector<1x1x24xf32>
    %57 = vector.shape_cast %56 : vector<1x1x24xf32> to vector<1x24xf32>
    %58 = vector.broadcast %57 : vector<1x24xf32> to vector<64x24xf32>
    %59 = arith.addf %54, %58 : vector<64x24xf32>
    %60 = vector.extract_strided_slice %59 {offsets = [0, 0], sizes = [64, 8], strides = [1, 1]} : vector<64x24xf32> to vector<64x8xf32>
    %61 = vector.extract_strided_slice %59 {offsets = [0, 8], sizes = [64, 8], strides = [1, 1]} : vector<64x24xf32> to vector<64x8xf32>
    %62 = vector.extract_strided_slice %59 {offsets = [0, 16], sizes = [64, 8], strides = [1, 1]} : vector<64x24xf32> to vector<64x8xf32>
    %cst_34 = arith.constant dense<0.000000e+00> : vector<64x64xf32>
    %63 = tpu.matmul %60, %61, %cst_34 {dimension_numbers = #tpu.dot_dimension_numbers<[1], [1], [0], [0], [0, 0, 1, 0], [], []>} : vector<64x8xf32>, vector<64x8xf32>, vector<64x64xf32> -> vector<64x64xf32>
    %c0_35 = arith.constant 0 : index
    %c0_36 = arith.constant 0 : index
    %c0_37 = arith.constant 0 : index
    %64 = vector.load %arg9[%c0_35, %c0_36, %c0_37] : memref<1x64x64xf32, #tpu.memory_space<vmem>>, vector<1x64x64xf32>
    %65 = vector.shape_cast %64 : vector<1x64x64xf32> to vector<64x64xf32>
    %66 = arith.mulf %63, %65 : vector<64x64xf32>
    %cst_38 = arith.constant dense<0xFF800000> : vector<64xf32>
    %67 = vector.multi_reduction <maximumf>, %66, %cst_38 [1] : vector<64x64xf32> to vector<64xf32>
    %68 = vector.shape_cast %67 : vector<64xf32> to vector<64x1xf32>
    %69 = vector.broadcast %68 : vector<64x1xf32> to vector<64x64xf32>
    %70 = arith.subf %66, %69 : vector<64x64xf32>
    %71 = math.exp %70 : vector<64x64xf32>
    %cst_39 = arith.constant dense<0.000000e+00> : vector<64xf32>
    %72 = vector.multi_reduction <add>, %71, %cst_39 [1] : vector<64x64xf32> to vector<64xf32>
    %73 = vector.shape_cast %72 : vector<64xf32> to vector<64x1xf32>
    %74 = tpu.reciprocal %73 : vector<64x1xf32> -> vector<64x1xf32>
    %75 = vector.broadcast %74 : vector<64x1xf32> to vector<64x64xf32>
    %76 = arith.mulf %71, %75 : vector<64x64xf32>
    %cst_40 = arith.constant dense<0.000000e+00> : vector<64x8xf32>
    %77 = tpu.matmul %76, %62, %cst_40 {dimension_numbers = #tpu.dot_dimension_numbers<[1], [0], [0], [1], [0, 0, 1, 1], [], []>} : vector<64x64xf32>, vector<64x8xf32>, vector<64x8xf32> -> vector<64x8xf32>
    %78 = arith.index_cast %c1_i32 : i32 to index
    %c0_41 = arith.constant 0 : index
    %c0_42 = arith.constant 0 : index
    %c0_43 = arith.constant 0 : index
    %79 = vector.load %arg10[%78, %c0_41, %c0_42, %c0_43] : memref<4x1x64x8xf32, #tpu.memory_space<vmem>>, vector<1x1x64x8xf32>
    %80 = vector.shape_cast %79 : vector<1x1x64x8xf32> to vector<64x8xf32>
    %81 = vector.shape_cast %77 : vector<64x8xf32> to vector<1x1x64x8xf32>
    tpu.vector_store %arg10[%78, %c0_41, %c0_42, %c0_43], %81 {strides = array<i32>} : memref<4x1x64x8xf32, #tpu.memory_space<vmem>>, vector<1x1x64x8xf32>,
    %c2_i32 = arith.constant 2 : i32
    %c0_44 = arith.constant 0 : index
    %c0_45 = arith.constant 0 : index
    %82 = vector.load %arg1[%c0_44, %c0_45] : memref<64x32xf32, #tpu.memory_space<vmem>>, vector<64x32xf32>
    %83 = arith.index_cast %c2_i32 : i32 to index
    %c0_46 = arith.constant 0 : index
    %c0_47 = arith.constant 0 : index
    %84 = vector.load %arg4[%83, %c0_46, %c0_47] : memref<4x32x24xf32, #tpu.memory_space<vmem>>, vector<1x32x24xf32>
    %85 = vector.shape_cast %84 : vector<1x32x24xf32> to vector<32x24xf32>
    %cst_48 = arith.constant dense<0.000000e+00> : vector<64x24xf32>
    %86 = tpu.matmul %82, %85, %cst_48 {dimension_numbers = #tpu.dot_dimension_numbers<[1], [0], [0], [1], [0, 0, 1, 1], [], []>} : vector<64x32xf32>, vector<32x24xf32>, vector<64x24xf32> -> vector<64x24xf32>
    %87 = arith.index_cast %c2_i32 : i32 to index
    %c0_49 = arith.constant 0 : index
    %c0_50 = arith.constant 0 : index
    %88 = vector.load %arg5[%87, %c0_49, %c0_50] : memref<4x1x24xf32, #tpu.memory_space<vmem>>, vector<1x1x24xf32>
    %89 = vector.shape_cast %88 : vector<1x1x24xf32> to vector<1x24xf32>
    %90 = vector.broadcast %89 : vector<1x24xf32> to vector<64x24xf32>
    %91 = arith.addf %86, %90 : vector<64x24xf32>
    %92 = vector.extract_strided_slice %91 {offsets = [0, 0], sizes = [64, 8], strides = [1, 1]} : vector<64x24xf32> to vector<64x8xf32>
    %93 = vector.extract_strided_slice %91 {offsets = [0, 8], sizes = [64, 8], strides = [1, 1]} : vector<64x24xf32> to vector<64x8xf32>
    %94 = vector.extract_strided_slice %91 {offsets = [0, 16], sizes = [64, 8], strides = [1, 1]} : vector<64x24xf32> to vector<64x8xf32>
    %cst_51 = arith.constant dense<0.000000e+00> : vector<64x64xf32>
    %95 = tpu.matmul %92, %93, %cst_51 {dimension_numbers = #tpu.dot_dimension_numbers<[1], [1], [0], [0], [0, 0, 1, 0], [], []>} : vector<64x8xf32>, vector<64x8xf32>, vector<64x64xf32> -> vector<64x64xf32>
    %c0_52 = arith.constant 0 : index
    %c0_53 = arith.constant 0 : index
    %c0_54 = arith.constant 0 : index
    %96 = vector.load %arg9[%c0_52, %c0_53, %c0_54] : memref<1x64x64xf32, #tpu.memory_space<vmem>>, vector<1x64x64xf32>
    %97 = vector.shape_cast %96 : vector<1x64x64xf32> to vector<64x64xf32>
    %98 = arith.mulf %95, %97 : vector<64x64xf32>
    %cst_55 = arith.constant dense<0xFF800000> : vector<64xf32>
    %99 = vector.multi_reduction <maximumf>, %98, %cst_55 [1] : vector<64x64xf32> to vector<64xf32>
    %100 = vector.shape_cast %99 : vector<64xf32> to vector<64x1xf32>
    %101 = vector.broadcast %100 : vector<64x1xf32> to vector<64x64xf32>
    %102 = arith.subf %98, %101 : vector<64x64xf32>
    %103 = math.exp %102 : vector<64x64xf32>
    %cst_56 = arith.constant dense<0.000000e+00> : vector<64xf32>
    %104 = vector.multi_reduction <add>, %103, %cst_56 [1] : vector<64x64xf32> to vector<64xf32>
    %105 = vector.shape_cast %104 : vector<64xf32> to vector<64x1xf32>
    %106 = tpu.reciprocal %105 : vector<64x1xf32> -> vector<64x1xf32>
    %107 = vector.broadcast %106 : vector<64x1xf32> to vector<64x64xf32>
    %108 = arith.mulf %103, %107 : vector<64x64xf32>
    %cst_57 = arith.constant dense<0.000000e+00> : vector<64x8xf32>
    %109 = tpu.matmul %108, %94, %cst_57 {dimension_numbers = #tpu.dot_dimension_numbers<[1], [0], [0], [1], [0, 0, 1, 1], [], []>} : vector<64x64xf32>, vector<64x8xf32>, vector<64x8xf32> -> vector<64x8xf32>
    %110 = arith.index_cast %c2_i32 : i32 to index
    %c0_58 = arith.constant 0 : index
    %c0_59 = arith.constant 0 : index
    %c0_60 = arith.constant 0 : index
    %111 = vector.load %arg10[%110, %c0_58, %c0_59, %c0_60] : memref<4x1x64x8xf32, #tpu.memory_space<vmem>>, vector<1x1x64x8xf32>
    %112 = vector.shape_cast %111 : vector<1x1x64x8xf32> to vector<64x8xf32>
    %113 = vector.shape_cast %109 : vector<64x8xf32> to vector<1x1x64x8xf32>
    tpu.vector_store %arg10[%110, %c0_58, %c0_59, %c0_60], %113 {strides = array<i32>} : memref<4x1x64x8xf32, #tpu.memory_space<vmem>>, vector<1x1x64x8xf32>,
    %c3_i32 = arith.constant 3 : i32
    %c0_61 = arith.constant 0 : index
    %c0_62 = arith.constant 0 : index
    %114 = vector.load %arg1[%c0_61, %c0_62] : memref<64x32xf32, #tpu.memory_space<vmem>>, vector<64x32xf32>
    %115 = arith.index_cast %c3_i32 : i32 to index
    %c0_63 = arith.constant 0 : index
    %c0_64 = arith.constant 0 : index
    %116 = vector.load %arg4[%115, %c0_63, %c0_64] : memref<4x32x24xf32, #tpu.memory_space<vmem>>, vector<1x32x24xf32>
    %117 = vector.shape_cast %116 : vector<1x32x24xf32> to vector<32x24xf32>
    %cst_65 = arith.constant dense<0.000000e+00> : vector<64x24xf32>
    %118 = tpu.matmul %114, %117, %cst_65 {dimension_numbers = #tpu.dot_dimension_numbers<[1], [0], [0], [1], [0, 0, 1, 1], [], []>} : vector<64x32xf32>, vector<32x24xf32>, vector<64x24xf32> -> vector<64x24xf32>
    %119 = arith.index_cast %c3_i32 : i32 to index
    %c0_66 = arith.constant 0 : index
    %c0_67 = arith.constant 0 : index
    %120 = vector.load %arg5[%119, %c0_66, %c0_67] : memref<4x1x24xf32, #tpu.memory_space<vmem>>, vector<1x1x24xf32>
    %121 = vector.shape_cast %120 : vector<1x1x24xf32> to vector<1x24xf32>
    %122 = vector.broadcast %121 : vector<1x24xf32> to vector<64x24xf32>
    %123 = arith.addf %118, %122 : vector<64x24xf32>
    %124 = vector.extract_strided_slice %123 {offsets = [0, 0], sizes = [64, 8], strides = [1, 1]} : vector<64x24xf32> to vector<64x8xf32>
    %125 = vector.extract_strided_slice %123 {offsets = [0, 8], sizes = [64, 8], strides = [1, 1]} : vector<64x24xf32> to vector<64x8xf32>
    %126 = vector.extract_strided_slice %123 {offsets = [0, 16], sizes = [64, 8], strides = [1, 1]} : vector<64x24xf32> to vector<64x8xf32>
    %cst_68 = arith.constant dense<0.000000e+00> : vector<64x64xf32>
    %127 = tpu.matmul %124, %125, %cst_68 {dimension_numbers = #tpu.dot_dimension_numbers<[1], [1], [0], [0], [0, 0, 1, 0], [], []>} : vector<64x8xf32>, vector<64x8xf32>, vector<64x64xf32> -> vector<64x64xf32>
    %c0_69 = arith.constant 0 : index
    %c0_70 = arith.constant 0 : index
    %c0_71 = arith.constant 0 : index
    %128 = vector.load %arg9[%c0_69, %c0_70, %c0_71] : memref<1x64x64xf32, #tpu.memory_space<vmem>>, vector<1x64x64xf32>
    %129 = vector.shape_cast %128 : vector<1x64x64xf32> to vector<64x64xf32>
    %130 = arith.mulf %127, %129 : vector<64x64xf32>
    %cst_72 = arith.constant dense<0xFF800000> : vector<64xf32>
    %131 = vector.multi_reduction <maximumf>, %130, %cst_72 [1] : vector<64x64xf32> to vector<64xf32>
    %132 = vector.shape_cast %131 : vector<64xf32> to vector<64x1xf32>
    %133 = vector.broadcast %132 : vector<64x1xf32> to vector<64x64xf32>
    %134 = arith.subf %130, %133 : vector<64x64xf32>
    %135 = math.exp %134 : vector<64x64xf32>
    %cst_73 = arith.constant dense<0.000000e+00> : vector<64xf32>
    %136 = vector.multi_reduction <add>, %135, %cst_73 [1] : vector<64x64xf32> to vector<64xf32>
    %137 = vector.shape_cast %136 : vector<64xf32> to vector<64x1xf32>
    %138 = tpu.reciprocal %137 : vector<64x1xf32> -> vector<64x1xf32>
    %139 = vector.broadcast %138 : vector<64x1xf32> to vector<64x64xf32>
    %140 = arith.mulf %135, %139 : vector<64x64xf32>
    %cst_74 = arith.constant dense<0.000000e+00> : vector<64x8xf32>
    %141 = tpu.matmul %140, %126, %cst_74 {dimension_numbers = #tpu.dot_dimension_numbers<[1], [0], [0], [1], [0, 0, 1, 1], [], []>} : vector<64x64xf32>, vector<64x8xf32>, vector<64x8xf32> -> vector<64x8xf32>
    %142 = arith.index_cast %c3_i32 : i32 to index
    %c0_75 = arith.constant 0 : index
    %c0_76 = arith.constant 0 : index
    %c0_77 = arith.constant 0 : index
    %143 = vector.load %arg10[%142, %c0_75, %c0_76, %c0_77] : memref<4x1x64x8xf32, #tpu.memory_space<vmem>>, vector<1x1x64x8xf32>
    %144 = vector.shape_cast %143 : vector<1x1x64x8xf32> to vector<64x8xf32>
    %145 = vector.shape_cast %141 : vector<64x8xf32> to vector<1x1x64x8xf32>
    tpu.vector_store %arg10[%142, %c0_75, %c0_76, %c0_77], %145 {strides = array<i32>} : memref<4x1x64x8xf32, #tpu.memory_space<vmem>>, vector<1x1x64x8xf32>,
    %c4_i32 = arith.constant 4 : i32
    %c0_78 = arith.constant 0 : index
    %c0_79 = arith.constant 0 : index
    %c0_80 = arith.constant 0 : index
    %c0_81 = arith.constant 0 : index
    %146 = vector.load %arg10[%c0_78, %c0_79, %c0_80, %c0_81] : memref<4x1x64x8xf32, #tpu.memory_space<vmem>>, vector<1x1x64x8xf32>
    %147 = vector.shape_cast %146 : vector<1x1x64x8xf32> to vector<64x8xf32>
    %c0_82 = arith.constant 0 : index
    %c0_83 = arith.constant 0 : index
    %148 = vector.load %arg11[%c0_82, %c0_83] : memref<64x32xf32, #tpu.memory_space<vmem>>, vector<64x8xf32>
    tpu.vector_store %arg11[%c0_82, %c0_83], %147 {strides = array<i32>} : memref<64x32xf32, #tpu.memory_space<vmem>>, vector<64x8xf32>,
    %c1 = arith.constant 1 : index
    %c0_84 = arith.constant 0 : index
    %c0_85 = arith.constant 0 : index
    %c0_86 = arith.constant 0 : index
    %149 = vector.load %arg10[%c1, %c0_84, %c0_85, %c0_86] : memref<4x1x64x8xf32, #tpu.memory_space<vmem>>, vector<1x1x64x8xf32>
    %150 = vector.shape_cast %149 : vector<1x1x64x8xf32> to vector<64x8xf32>
    %c0_87 = arith.constant 0 : index
    %c8 = arith.constant 8 : index
    %151 = vector.load %arg11[%c0_87, %c8] : memref<64x32xf32, #tpu.memory_space<vmem>>, vector<64x8xf32>
    tpu.vector_store %arg11[%c0_87, %c8], %150 {strides = array<i32>} : memref<64x32xf32, #tpu.memory_space<vmem>>, vector<64x8xf32>,
    %c2 = arith.constant 2 : index
    %c0_88 = arith.constant 0 : index
    %c0_89 = arith.constant 0 : index
    %c0_90 = arith.constant 0 : index
    %152 = vector.load %arg10[%c2, %c0_88, %c0_89, %c0_90] : memref<4x1x64x8xf32, #tpu.memory_space<vmem>>, vector<1x1x64x8xf32>
    %153 = vector.shape_cast %152 : vector<1x1x64x8xf32> to vector<64x8xf32>
    %c0_91 = arith.constant 0 : index
    %c16 = arith.constant 16 : index
    %154 = vector.load %arg11[%c0_91, %c16] : memref<64x32xf32, #tpu.memory_space<vmem>>, vector<64x8xf32>
    tpu.vector_store %arg11[%c0_91, %c16], %153 {strides = array<i32>} : memref<64x32xf32, #tpu.memory_space<vmem>>, vector<64x8xf32>,
    %c3 = arith.constant 3 : index
    %c0_92 = arith.constant 0 : index
    %c0_93 = arith.constant 0 : index
    %c0_94 = arith.constant 0 : index
    %155 = vector.load %arg10[%c3, %c0_92, %c0_93, %c0_94] : memref<4x1x64x8xf32, #tpu.memory_space<vmem>>, vector<1x1x64x8xf32>
    %156 = vector.shape_cast %155 : vector<1x1x64x8xf32> to vector<64x8xf32>
    %c0_95 = arith.constant 0 : index
    %c24 = arith.constant 24 : index
    %157 = vector.load %arg11[%c0_95, %c24] : memref<64x32xf32, #tpu.memory_space<vmem>>, vector<64x8xf32>
    tpu.vector_store %arg11[%c0_95, %c24], %156 {strides = array<i32>} : memref<64x32xf32, #tpu.memory_space<vmem>>, vector<64x8xf32>,
    %c0_96 = arith.constant 0 : index
    %c0_97 = arith.constant 0 : index
    %158 = vector.load %arg11[%c0_96, %c0_97] : memref<64x32xf32, #tpu.memory_space<vmem>>, vector<64x32xf32>
    %c0_98 = arith.constant 0 : index
    %c0_99 = arith.constant 0 : index
    %159 = vector.load %arg6[%c0_98, %c0_99] : memref<32x32xf32, #tpu.memory_space<vmem>>, vector<32x32xf32>
    %cst_100 = arith.constant dense<0.000000e+00> : vector<64x32xf32>
    %160 = tpu.matmul %158, %159, %cst_100 {dimension_numbers = #tpu.dot_dimension_numbers<[1], [0], [0], [1], [0, 0, 1, 1], [], []>} : vector<64x32xf32>, vector<32x32xf32>, vector<64x32xf32> -> vector<64x32xf32>
    %c0_101 = arith.constant 0 : index
    %c0_102 = arith.constant 0 : index
    %161 = vector.load %arg7[%c0_101, %c0_102] : memref<1x32xf32, #tpu.memory_space<vmem>>, vector<1x32xf32>
    %162 = vector.broadcast %161 : vector<1x32xf32> to vector<64x32xf32>
    %163 = arith.addf %160, %162 : vector<64x32xf32>
    %c0_103 = arith.constant 0 : index
    %c0_104 = arith.constant 0 : index
    %164 = vector.load %arg8[%c0_103, %c0_104] : memref<64x32xf32, #tpu.memory_space<vmem>>, vector<64x32xf32>
    tpu.vector_store %arg8[%c0_103, %c0_104], %163 {strides = array<i32>} : memref<64x32xf32, #tpu.memory_space<vmem>>, vector<64x32xf32>,
    return
  }
  func.func @transform_0(%arg0: i32) -> (i32, i32) {
    %c0_i32 = arith.constant 0 : i32
    %c0_i32_0 = arith.constant 0 : i32
    return %arg0, %c0_i32 : i32, i32
  }
  func.func @transform_1(%arg0: i32) -> (i32, i32, i32) {
    %c0_i32 = arith.constant 0 : i32
    %c0_i32_0 = arith.constant 0 : i32
    %c0_i32_1 = arith.constant 0 : i32
    return %arg0, %c0_i32, %c0_i32_0 : i32, i32, i32
  }
  func.func @transform_2(%arg0: i32) -> (i32, i32, i32) {
    %c0_i32 = arith.constant 0 : i32
    %c0_i32_0 = arith.constant 0 : i32
    %c0_i32_1 = arith.constant 0 : i32
    return %arg0, %c0_i32, %c0_i32_0 : i32, i32, i32
  }
  func.func @transform_3(%arg0: i32) -> (i32, i32, i32) {
    %c0_i32 = arith.constant 0 : i32
    %c0_i32_0 = arith.constant 0 : i32
    %c0_i32_1 = arith.constant 0 : i32
    %c0_i32_2 = arith.constant 0 : i32
    return %c0_i32, %c0_i32_0, %c0_i32_1 : i32, i32, i32
  }
  func.func @transform_4(%arg0: i32) -> (i32, i32, i32) {
    %c0_i32 = arith.constant 0 : i32
    %c0_i32_0 = arith.constant 0 : i32
    %c0_i32_1 = arith.constant 0 : i32
    %c0_i32_2 = arith.constant 0 : i32
    return %c0_i32, %c0_i32_0, %c0_i32_1 : i32, i32, i32
  }
  func.func @transform_5(%arg0: i32) -> (i32, i32) {
    %c0_i32 = arith.constant 0 : i32
    %c0_i32_0 = arith.constant 0 : i32
    %c0_i32_1 = arith.constant 0 : i32
    return %c0_i32, %c0_i32_0 : i32, i32
  }
  func.func @transform_6(%arg0: i32) -> (i32, i32) {
    %c0_i32 = arith.constant 0 : i32
    %c0_i32_0 = arith.constant 0 : i32
    %c0_i32_1 = arith.constant 0 : i32
    return %c0_i32, %c0_i32_0 : i32, i32
  }
  func.func @transform_7(%arg0: i32) -> (i32, i32) {
    %c0_i32 = arith.constant 0 : i32
    %c0_i32_0 = arith.constant 0 : i32
    return %arg0, %c0_i32 : i32, i32
  }
}

</mosaic_0001>

<bundles_post_ra>
// kernel: tpu_custom_call.1
= control target key start
LH: loop header
LB: loop body
LE: loop exit
PB: predicated region body
PF: predicated region fallthrough
CT: control target
= control target key end

     0   :  { %s4390_s24 = smov 0   ;;  %s5180_s0 = inlined_call_operand.vmem [shape: f32[128,32], index: 0, kind: input, shape index: {}]   ;;  %s5181_s1 = inlined_call_operand.vmem [shape: f32[2,1,64], index: 1, kind: input, shape index: {}]   ;;  %s5182_s2 = inlined_call_operand.vmem [shape: f32[2,64,1], index: 2, kind: input, shape index: {}]   ;;  %s5183_s3 = inlined_call_operand.vmem [shape: f32[4,32,24], index: 3, kind: input, shape index: {}]   ;;  %s5184_s4 = inlined_call_operand.vmem [shape: f32[4,1,24], index: 4, kind: input, shape index: {}]   ;;  %s5185_s5 = inlined_call_operand.vmem [shape: f32[32,32], index: 5, kind: input, shape index: {}]   ;;  %s5186_s6 = inlined_call_operand.vmem [shape: f32[1,32], index: 6, kind: input, shape index: {}]   ;;  %s5187_s7 = inlined_call_operand.vmem [shape: f32[128,32], index: 7, kind: output, shape index: {}]  }
   0x1 LB: > { %s4396_s25 = sadd.s32 4294967295, %s4341_s24   ;;  %p3128_p0 = scmp.ge.s32.totalorder %s4341_s24, 1  ;;  %s4341_s24 = sphi %s4390_s24, %s17_s24  }
   0x2   : > { %p256_p1 = scmp.lt.s32.totalorder %s4341_s24, 3 }
   0x4   : > { %p257_p2 = pnand %p3128_p0, %p256_p1 }
   0x5   : > { %v429_v0 = vld [vmem:[%s5183_s3] sm:$0xff] (!%p257_p2)  ;;  %v430_v1 = vld [vmem:[%s5183_s3 + $0x8] sm:$0xff] (!%p257_p2)  ;;  %v431_v2 = vld [vmem:[%s5183_s3 + $0x10] sm:$0xff] (!%p257_p2)  ;;  %s3129_s9 = sshll.u32 (!%p257_p2), %s4396_s25, 3  ;;  %vm440_vm0 = vcmask (!%p257_p2), 261120   ;;  %vm594_vm1 = vcmask (!%p257_p2), 64512  }
   0x6   : > { %260 = sbr.rel (%p257_p2) target bundleno = 4319 (0x10df), region = 48  ;;  %v3814_v3 = vpack.c.bf16 (!%p257_p2), %v430_v1, %v429_v0  ;;  %v432_v4 = vld [vmem:[%s5183_s3 + $0x18] sm:$0xff] (!%p257_p2)  ;;  %p297_p3 = scmp.lt.s32.totalorder (!%p257_p2), %s3129_s9, 15  ;;  %v3143_v14 = vld [vmem:[%s5184_s4] ss:$0 sm:$0xff] (!%p257_p2)  ;;  %v4344_v35 = vmov (!%p257_p2), 0   ;;  %vm4514_vm11 = vmpackc.low (!%p257_p2), %vm594_vm1, %vm594_vm1 }
   0x7   : > { %v3818_v5 = vpack.c.bf16 (!%p257_p2), %v432_v4, %v431_v2  ;;  %s4343_s18 = smov (!%p257_p2), 120   ;;  %p302_p4 = scmp.lt.s32.totalorder (!%p257_p2), %s4396_s25, 1  ;;  %4058 = vset.pattern.permute.xlu1 (!%p257_p2), %v4344_v35  ;;  %4057 = vset.pattern.permute.xlu0 (!%p257_p2), %v4344_v35 }
   0x8   : > { %3815 = vmatprep.subr.bf16.mxu0 (!%p257_p2), %v3814_v3  ;;  %s4348_s21 = smov (!%p257_p2), 16   ;;  %s4349_s30 = smov (!%p257_p2), 24  }
   0x9   : > { %3817 = vmatpush3.bf16.msra.mxu0 (!%p257_p2), %v3814_v3 }
   0xa   : > { %3819 = vmatprep.subr.bf16.mxu0 (!%p257_p2), %v3818_v5 }
   0xd   : > { %s5191_s9 = smov (!%p297_p3, %s3129_s9), 15  ;;  %3821 = vmatpush3.bf16.msra.mxu0 %v3818_v5  ;;  %s5193_s25 = smov (!%p302_p4, %s4396_s25), 1 }
   0xe   : > { %s3130_s12 = sshll.u32 %s5191_s9, 3  ;;  %s3301_s19 = sshll.u32 %s5193_s25, 6 }
   0xf   : > { %s4421_s15 = scalar_lea.vmem %s5180_s0, %s3130_s12  ;;  %s304_s22 = scalar_lea.vmem %s5181_s1, %s5193_s25 }
  0x10   : > { %v4424_v6 = vld [vmem:[%s4421_s15] sm:$0xff]  ;;  %v4429_v7 = vld [vmem:[%s4421_s15 + $0x8] sm:$0xff]  ;;  %v4432_v8 = vld [vmem:[%s4421_s15 + $0x10] sm:$0xff]  ;;  %s309_s27 = scalar_lea.vmem %s5182_s2, %s3301_s19  ;;  %s4346_s25 = smov 112  }
  0x11   : > { %3498 = vmatprep.mubr.msk.f32.mxu0 %vm440_vm0, %v4424_v6  ;;  %v4439_v9 = vld [vmem:[%s4421_s15 + $0x18] sm:$0xff]  ;;  %v4442_v10 = vld [vmem:[%s4421_s15 + $0x20] sm:$0xff]  ;;  %v4449_v11 = vld [vmem:[%s4421_s15 + $0x28] sm:$0xff]  ;;  %s314_s14 = scalar_lea.vmem %s5187_s7, %s3130_s12 }
  0x12   : > { %3499 = vmatmul.mubr.msk.f32.vlgmr.msra.gmra.mrb[0].mxu0 %vm440_vm0, %v4429_v7  ;;  %v4452_v12 = vld [vmem:[%s4421_s15 + $0x30] sm:$0xff]  ;;  %v4459_v13 = vld [vmem:[%s4421_s15 + $0x38] sm:$0xff]  ;;  %v316_v36 = vld [vmem:[%s304_s22] sm:$0x1] }
  0x13   : > { %3501 = vmatprep.mubr.msk.f32.mxu0 %vm440_vm0, %v4432_v8  ;;  %v318_v37 = vld [vmem:[%s309_s27 + $0x8] sm:$0xff]  ;;  %v317_v38 = vld [vmem:[%s309_s27] sm:$0xff]  ;;  %v319_v39 = vld [vmem:[%s309_s27 + $0x10] sm:$0xff]  ;;  %vm325_vm6 = vcmp.ge.f32.partialorder %v316_v36, 0.5 }
  0x14   : > { %vm327_vm2 = vcmp.lt.f32.partialorder %v318_v37, 0.5  ;;  %vm326_vm3 = vcmp.lt.f32.partialorder %v317_v38, 0.5  ;;  %vm328_vm4 = vcmp.lt.f32.partialorder %v319_v39, 0.5  ;;  %v320_v40 = vld [vmem:[%s309_s27 + $0x18] sm:$0xff]  ;;  %v321_v43 = vld [vmem:[%s309_s27 + $0x20] sm:$0xff]  ;;  %v322_v44 = vld [vmem:[%s309_s27 + $0x28] sm:$0xff] }
  0x15   : > { %v341_v41 = vsel %vm327_vm2, 1, %v4344_v35  ;;  %v340_v42 = vsel %vm326_vm3, 1, %v4344_v35  ;;  %vm329_vm5 = vcmp.lt.f32.partialorder %v320_v40, 0.5  ;;  %v342_v45 = vsel %vm328_vm4, 1, %v4344_v35  ;;  %v323_v48 = vld [vmem:[%s309_s27 + $0x30] sm:$0xff]  ;;  %v324_v49 = vld [vmem:[%s309_s27 + $0x38] sm:$0xff] }
  0x16   : > { %3502 = vmatmul.mubr.msk.f32.gmra.mrb[2].mxu0 %vm440_vm0, %v4439_v9  ;;  %v343_v46 = vsel %vm329_vm5, 1, %v4344_v35  ;;  %vm330_vm7 = vcmp.lt.f32.partialorder %v321_v43, 0.5  ;;  %vm331_vm8 = vcmp.lt.f32.partialorder %v322_v44, 0.5  ;;  %v334_v47 = vsel %vm325_vm6, 1, %v4344_v35 }
  0x17   : > { %3504 = vmatprep.mubr.msk.f32.mxu0 %vm440_vm0, %v4442_v10  ;;  %v344_v50 = vsel %vm330_vm7, 1, %v4344_v35  ;;  %v345_v51 = vsel %vm331_vm8, 1, %v4344_v35  ;;  %vm332_vm9 = vcmp.lt.f32.partialorder %v323_v48, 0.5  ;;  %vm333_vm10 = vcmp.lt.f32.partialorder %v324_v49, 0.5 }
  0x18   : > { %v346_v52 = vsel %vm332_vm9, 1, %v4344_v35  ;;  %v347_v53 = vsel %vm333_vm10, 1, %v4344_v35  ;;  %vm412_vm2 = vcmask 523264  }
  0x1a   : > { %3505 = vmatmul.mubr.msk.f32.gmra.mrb[4].mxu0 %vm440_vm0, %v4449_v11 }
  0x1b   : > { %3507 = vmatprep.mubr.msk.f32.mxu0 %vm440_vm0, %v4452_v12 }
  0x1e   : > { %3508 = vmatmul.mubr.msk.f32.gmra.mrb[6].mxu0 %vm440_vm0, %v4459_v13 }
  0xe5   : > { %v3500_v15 = vpop.f32.mrb[0].mxu0 }
  0xe6   : > { %v4466_v16 = vadd.f32 %v3500_v15, %v3143_v14  ;;  %v531_v17 = vpop.f32.mrb[1].mxu0  ;;  %v335_v15 = vlaneseq }
  0xe7   : > { %v532_v18 = vadd.f32 %v3143_v14, %v531_v17 }
  0xe8   : > { %v336_v17 = vshrl.u32 %v335_v15, 7 }
  0xe9   : > { %3526 = vmatprep.mubr.msk.f32.mxu1 %vm594_vm1, %v532_v18  ;;  %v4470_v19 = vpack.i.bf16 %v4466_v16, %v532_v18  ;;  %v3503_v20 = vpop.f32.mrb[2].mxu0 }
  0xea   : > { %v4472_v21 = vadd.f32 %v3503_v20, %v3143_v14  ;;  %v541_v22 = vpop.f32.mrb[3].mxu0  ;;  %v337_v18 = vsub.s32 0, %v336_v17 }
  0xeb   : > { %4038 = vrot.lane.b32.xlu0 %v4470_v19, %s4343_s18  ;;  %v4476_v23 = vadd.f32 %v3143_v14, %v541_v22 }
  0xed   : > { %v4480_v24 = vpack.i.bf16 %v4472_v21, %v4476_v23  ;;  %v3506_v25 = vpop.f32.mrb[4].mxu0 }
  0xee   : > { %v4482_v26 = vadd.f32 %v3506_v25, %v3143_v14  ;;  %v551_v27 = vpop.f32.mrb[5].mxu0 }
  0xef   : > { %4043 = vrot.lane.b32.xlu0 %v4480_v24, %s4343_s18  ;;  %v4486_v28 = vadd.f32 %v3143_v14, %v551_v27 }
  0xf1   : > { %v4490_v29 = vpack.i.bf16 %v4482_v26, %v4486_v28  ;;  %v3509_v30 = vpop.f32.mrb[6].mxu0 }
  0xf2   : > { %v4492_v31 = vadd.f32 %v3509_v30, %v3143_v14  ;;  %v561_v32 = vpop.f32.mrb[7].mxu0 }
  0xf3   : > { %4048 = vrot.lane.b32.xlu1 %v4490_v29, %s4343_s18  ;;  %v4496_v33 = vadd.f32 %v3143_v14, %v561_v32  ;;  %349 = vperm.xlu0 %4057, %v340_v42  }
  0xf5   : > { %v4500_v34 = vpack.i.bf16 %v4492_v31, %v4496_v33 }
  0xf7   : > { %4053 = vrot.lane.b32.xlu1 %v4500_v34, %s4343_s18  ;;  %358 = vperm.xlu0 %4057, %v343_v46  }
  0xfb   : > { %352 = vperm.xlu1 %4058, %v341_v41   ;;  %364 = vperm.xlu0 %4057, %v345_v51  }
  0xff   : > { %355 = vperm.xlu1 %4058, %v342_v45   ;;  %370 = vperm.xlu0 %4057, %v347_v53  }
 0x103   : > { %361 = vperm.xlu1 %4058, %v344_v50  }
 0x107   : > { %367 = vperm.xlu1 %4058, %v346_v52  }
 0x15d   : > { %v4039_v54 = vpop.permute.xlu0 %4038 }
 0x15e   : > { %v4041_v55 = vunpack.i.h.bf16 %v4039_v54  ;;  %v4040_v56 = vunpack.i.l.bf16 %v4039_v54 }
 0x160   : > { %v3822_v58 = vpack.c.bf16 %v4041_v55, %v4040_v56 }
 0x161   : > { %v4044_v59 = vpop.permute.xlu0 %4043 }
 0x162   : > { %3824 = vmatprep.subr.msk.bf16.mxu1 %vm4514_vm11, %v3822_v58  ;;  %v4046_v60 = vunpack.i.h.bf16 %v4044_v59  ;;  %v4045_v61 = vunpack.i.l.bf16 %v4044_v59 }
 0x163   : > { %3827 = vmatpush3.bf16.xpose.msk.msra.mxu1 %vm4514_vm11, %v3822_v58 }
 0x164   : > { %v3828_v62 = vpack.c.bf16 %v4046_v60, %v4045_v61 }
 0x165   : > { %v4049_v63 = vpop.permute.xlu1 %4048 }
 0x166   : > { %3830 = vmatprep.subr.msk.bf16.mxu1 %vm4514_vm11, %v3828_v62  ;;  %v4051_v0 = vunpack.i.h.bf16 %v4049_v63  ;;  %v4050_v1 = vunpack.i.l.bf16 %v4049_v63 }
 0x168   : > { %v3834_v2 = vpack.c.bf16 %v4051_v0, %v4050_v1 }
 0x169   : > { %v4054_v3 = vpop.permute.xlu1 %4053 }
 0x16a   : > { %v4056_v4 = vunpack.i.h.bf16 %v4054_v3  ;;  %v4055_v5 = vunpack.i.l.bf16 %v4054_v3 }
 0x16b   : > { %3833 = vmatpush3.bf16.xpose.msk.msra.mxu1 %vm4514_vm11, %v3828_v62 }
 0x16c   : > { %3836 = vmatprep.subr.msk.bf16.mxu1 %vm4514_vm11, %v3834_v2  ;;  %v3840_v14 = vpack.c.bf16 %v4056_v4, %v4055_v5 }
 0x172   : > { %v350_v22 = vpop.permute.xlu0 %349 }
 0x173   : > { %3839 = vmatpush3.bf16.xpose.msk.msra.mxu1 %vm4514_vm11, %v3834_v2  ;;  %vm372_vm14 = vcmp.eq.s32.totalorder %v350_v22, 1 }
 0x174   : > { %3842 = vmatprep.subr.msk.bf16.mxu1 %vm4514_vm11, %v3840_v14 }
 0x17a   : > { %v353_v20 = vpop.permute.xlu1 %352 }
 0x17b   : > { %3845 = vmatpush3.bf16.xpose.msk.msra.mxu1 %vm4514_vm11, %v3840_v14  ;;  %vm373_vm13 = vcmp.eq.s32.totalorder %v353_v20, 1 }
 0x17e   : > { %v356_v27 = vpop.permute.xlu1 %355 }
 0x17f   : > { %vm374_vm4 = vcmp.eq.s32.totalorder %v356_v27, 1 }
 0x182   : > { %3527 = vmatmul.mubr.msk.f32.vlgmr.msra.gmra.mrb[0].mxu1 %vm594_vm1, %v4466_v16  ;;  %v338_v16 = vrot.slane %v334_v47, %v337_v18  ;;  %v362_v35 = vpop.permute.xlu1 %361 }
 0x183   : > { %3529 = vmatprep.mubr.msk.f32.mxu1 %vm594_vm1, %v4476_v23  ;;  %vm376_vm8 = vcmp.eq.s32.totalorder %v362_v35, 1 }
 0x184   : > { %vm339_vm12 = vcmp.eq.s32.totalorder %v338_v16, 1 }
 0x185   : > { %vm381_vm15 = vmand %vm339_vm12, %vm373_vm13 }
 0x186   : > { %3530 = vmatmul.mubr.msk.f32.gmra.mrb[2].mxu1 %vm594_vm1, %v4472_v21  ;;  %v4345_v21 = vmov 0.0   ;;  %vm380_vm3 = vmand %vm339_vm12, %vm372_vm14  ;;  %v368_v41 = vpop.permute.xlu1 %367 }
 0x187   : > { %3532 = vmatprep.mubr.msk.f32.mxu1 %vm594_vm1, %v4486_v28  ;;  %v3136_v23 = vsel %vm381_vm15, 1.0, %v4345_v21  ;;  %v359_v28 = vpop.permute.xlu0 %358  ;;  %vm382_vm6 = vmand %vm339_vm12, %vm374_vm4  ;;  %vm378_vm14 = vcmp.eq.s32.totalorder %v368_v41, 1 }
 0x188   : > { %v405_v25 = vsub.f32 1.0, %v3136_v23  ;;  %vm375_vm5 = vcmp.eq.s32.totalorder %v359_v28, 1  ;;  %vm384_vm10 = vmand %vm339_vm12, %vm376_vm8 }
 0x189   : > { %vm383_vm7 = vmand %vm339_vm12, %vm375_vm5  ;;  %v3139_v38 = vsel %vm384_vm10, 1.0, %v4345_v21 }
 0x18a   : > { %3533 = vmatmul.mubr.msk.f32.gmra.mrb[4].mxu1 %vm594_vm1, %v4482_v26  ;;  %v3135_v26 = vsel %vm380_vm3, 1.0, %v4345_v21  ;;  %414 = vst.msk [vmem:[#allocation2 + $0x8] sm:$0xff] %vm412_vm2, %v405_v25  ;;  %v408_v39 = vsub.f32 1.0, %v3139_v38  ;;  %vm386_vm3 = vmand %vm339_vm12, %vm378_vm14 }
 0x18b   : > { %3535 = vmatprep.mubr.msk.f32.mxu1 %vm594_vm1, %v4496_v33  ;;  %v404_v30 = vsub.f32 1.0, %v3135_v26  ;;  %v3138_v33 = vsel %vm383_vm7, 1.0, %v4345_v21  ;;  %v365_v36 = vpop.permute.xlu0 %364  ;;  %v3141_v44 = vsel %vm386_vm3, 1.0, %v4345_v21 }
 0x18c   : > { %v407_v37 = vsub.f32 1.0, %v3138_v33  ;;  %vm377_vm9 = vcmp.eq.s32.totalorder %v365_v36, 1  ;;  %417 = vst.msk [vmem:[#allocation2 + $0x20] sm:$0xff] %vm412_vm2, %v408_v39  ;;  %v410_v45 = vsub.f32 1.0, %v3141_v44 }
 0x18d   : > { %413 = vst.msk [vmem:[#allocation2] sm:$0xff] %vm412_vm2, %v404_v30  ;;  %vm385_vm13 = vmand %vm339_vm12, %vm377_vm9 }
 0x18e   : > { %3536 = vmatmul.mubr.msk.f32.gmra.mrb[6].mxu1 %vm594_vm1, %v4492_v31  ;;  %v3137_v31 = vsel %vm382_vm6, 1.0, %v4345_v21  ;;  %416 = vst.msk [vmem:[#allocation2 + $0x18] sm:$0xff] %vm412_vm2, %v407_v37  ;;  %v3140_v40 = vsel %vm385_vm13, 1.0, %v4345_v21  ;;  %419 = vst.msk [vmem:[#allocation2 + $0x30] sm:$0xff] %vm412_vm2, %v410_v45 }
 0x18f   : > { %v406_v32 = vsub.f32 1.0, %v3137_v31  ;;  %v371_v42 = vpop.permute.xlu0 %370  ;;  %v409_v43 = vsub.f32 1.0, %v3140_v40 }
 0x190   : > { %vm379_vm15 = vcmp.eq.s32.totalorder %v371_v42, 1 }
 0x191   : > { %415 = vst.msk [vmem:[#allocation2 + $0x10] sm:$0xff] %vm412_vm2, %v406_v32  ;;  %418 = vst.msk [vmem:[#allocation2 + $0x28] sm:$0xff] %vm412_vm2, %v409_v43  ;;  %v4564_v48 = vld [vmem:[#allocation2 + $0x8] sm:$0xff] }
 0x192   : > { %vm387_vm4 = vmand %vm339_vm12, %vm379_vm15  ;;  %vm2833_vm12 = vcmask 195712  }
 0x193   : > { %v3142_v46 = vsel %vm387_vm4, 1.0, %v4345_v21  ;;  %v4583_v5 = vld [vmem:[#allocation2 + $0x20] sm:$0xff] }
 0x194   : > { %v411_v47 = vsub.f32 1.0, %v3142_v46  ;;  %v4566_v49 = vld [vmem:[#allocation2] sm:$0xff] }
 0x195   : > { %v4571_v56 = vld [vmem:[#allocation2 + $0x18] sm:$0xff]  ;;  %v4591_v21 = vld [vmem:[#allocation2 + $0x30] sm:$0xff]  ;;  %v2462_v57 = vld [vmem:[#allocation2] sm:$0xff] }
 0x196   : > { %420 = vst.msk [vmem:[#allocation2 + $0x38] sm:$0xff] %vm412_vm2, %v411_v47 }
 0x198   : > { %v4575_v61 = vld [vmem:[#allocation2 + $0x10] sm:$0xff]  ;;  %v4579_v1 = vld [vmem:[#allocation2 + $0x28] sm:$0xff] }
 0x19d   : > { %v4587_v18 = vld [vmem:[#allocation2 + $0x38] sm:$0xff] }
 0x255   : > { %v3528_v50 = vpop.f32.mrb[0].mxu1 }
 0x256   : > { %v741_v51 = vmul.f32 %v3528_v50, %v4564_v48  ;;  %v693_v52 = vpop.f32.mrb[1].mxu1 }
 0x257   : > { %v740_v53 = vmul.f32 %v4566_v49, %v693_v52 }
 0x258   : > { %v751_v54 = vsel %vm412_vm2, %v741_v51, -inf }
 0x259   : > { %752 = vmax.xlane.f32.xlu0 %v751_v54  ;;  %v3531_v55 = vpop.f32.mrb[2].mxu1  ;;  %v748_v58 = vsel %vm412_vm2, %v740_v53, -inf }
 0x25a   : > { %v743_v59 = vmul.f32 %v3531_v55, %v4571_v56  ;;  %749 = vmax.xlane.f32.xlu1 %v748_v58  ;;  %v703_v60 = vpop.f32.mrb[3].mxu1 }
 0x25b   : > { %v742_v62 = vmul.f32 %v4575_v61, %v703_v60 }
 0x25c   : > { %v757_v63 = vsel %vm412_vm2, %v743_v59, -inf }
 0x25d   : > { %v3534_v0 = vpop.f32.mrb[4].mxu1  ;;  %v754_v2 = vsel %vm412_vm2, %v742_v62, -inf }
 0x25e   : > { %v745_v3 = vmul.f32 %v3534_v0, %v4579_v1  ;;  %758 = vmax.xlane.f32.xlu1 %v757_v63  ;;  %755 = vmax.xlane.f32.xlu0 %v754_v2  ;;  %v713_v4 = vpop.f32.mrb[5].mxu1 }
 0x25f   : > { %v744_v14 = vmul.f32 %v4583_v5, %v713_v4 }
 0x260   : > { %v763_v15 = vsel %vm412_vm2, %v745_v3, -inf }
 0x261   : > { %v3537_v17 = vpop.f32.mrb[6].mxu1  ;;  %v760_v16 = vsel %vm412_vm2, %v744_v14, -inf }
 0x262   : > { %v747_v20 = vmul.f32 %v3537_v17, %v4587_v18  ;;  %764 = vmax.xlane.f32.xlu1 %v763_v15  ;;  %761 = vmax.xlane.f32.xlu0 %v760_v16  ;;  %v723_v22 = vpop.f32.mrb[7].mxu1 }
 0x263   : > { %v746_v23 = vmul.f32 %v4591_v21, %v723_v22 }
 0x264   : > { %v769_v25 = vsel %vm412_vm2, %v747_v20, -inf }
 0x265   : > { %v766_v26 = vsel %vm412_vm2, %v746_v23, -inf }
 0x266   : > { %770 = vmax.xlane.f32.xlu1 %v769_v25  ;;  %767 = vmax.xlane.f32.xlu0 %v766_v26 }
 0x27c   : > { %4060 = vrot.lane.b32.xlu0 %v4470_v19, %s4346_s25 }
 0x2e6   : > { %v753_v27 = vpop.xlane.xlu0 %752 }
 0x2e7   : > { %v773_v28 = vsub.f32 %v741_v51, %v753_v27  ;;  %v750_v30 = vpop.xlane.xlu1 %749 }
 0x2e8   : > { %v772_v31 = vsub.f32 %v740_v53, %v750_v30 }
 0x2e9   : > { %v782_v32 = vmul.f32 1.442695, %v773_v28 }
 0x2ea   : > { %v780_v33 = vmul.f32 1.442695, %v772_v31 }
 0x2eb   : > { %4199 = vpow2.f32 %v782_v32  ;;  %v759_v35 = vpop.xlane.xlu1 %758  ;;  %v756_v36 = vpop.xlane.xlu0 %755 }
 0x2ec   : > { %4201 = vpow2.f32 %v780_v33  ;;  %v775_v37 = vsub.f32 %v743_v59, %v759_v35  ;;  %v774_v38 = vsub.f32 %v742_v62, %v756_v36 }
 0x2ee   : > { %v786_v39 = vmul.f32 1.442695, %v775_v37  ;;  %v784_v40 = vmul.f32 1.442695, %v774_v38 }
 0x2ef   : > { %v765_v41 = vpop.xlane.xlu1 %764  ;;  %v762_v42 = vpop.xlane.xlu0 %761 }
 0x2f0   : > { %4203 = vpow2.f32 %v786_v39  ;;  %v777_v43 = vsub.f32 %v745_v3, %v765_v41  ;;  %v776_v44 = vsub.f32 %v744_v14, %v762_v42 }
 0x2f1   : > { %4205 = vpow2.f32 %v784_v40 }
 0x2f2   : > { %v790_v19 = vmul.f32 1.442695, %v777_v43  ;;  %v788_v45 = vmul.f32 1.442695, %v776_v44 }
 0x2f3   : > { %v771_v46 = vpop.xlane.xlu1 %770  ;;  %v768_v47 = vpop.xlane.xlu0 %767 }
 0x2f4   : > { %4207 = vpow2.f32 %v790_v19  ;;  %v779_v50 = vsub.f32 %v747_v20, %v771_v46  ;;  %v778_v51 = vsub.f32 %v746_v23, %v768_v47  ;;  %v3176_v46 = vld [vmem:[%s5183_s3 + $0x20] sm:$0xff]  ;;  %v3177_v47 = vld [vmem:[%s5183_s3 + $0x28] sm:$0xff] }
 0x2f5   : > { %v4598_v52 = vpop.eup %4199  ;;  %4209 = vpow2.f32 %v788_v45 }
 0x2f6   : > { %v4202_v53 = vpop.eup %4201  ;;  %v794_v54 = vmul.f32 1.442695, %v779_v50  ;;  %v792_v55 = vmul.f32 1.442695, %v778_v51  ;;  %v799_v58 = vsel %vm412_vm2, %v4598_v52, 0.0  ;;  %v3862_v51 = vpack.c.bf16 %v3177_v47, %v3176_v46 }
 0x2f7   : > { %800 = vadd.xlane.f32.xlu1 %v799_v58  ;;  %v4061_v59 = vpop.permute.xlu0 %4060  ;;  %v796_v60 = vsel %vm412_vm2, %v4202_v53, 0.0 }
 0x2f8   : > { %4211 = vpow2.f32 %v794_v54  ;;  %v4063_v62 = vunpack.i.h.bf16 %v4061_v59  ;;  %v4062_v63 = vunpack.i.l.bf16 %v4061_v59  ;;  %797 = vadd.xlane.f32.xlu0 %v796_v60  ;;  %v3178_v54 = vld [vmem:[%s5183_s3 + $0x30] sm:$0xff] }
 0x2f9   : > { %4213 = vpow2.f32 %v792_v55  ;;  %v3179_v55 = vld [vmem:[%s5183_s3 + $0x38] sm:$0xff] }
 0x2fa   : > { %v4603_v0 = vpop.eup %4203  ;;  %v3846_v2 = vpack.c.bf16 %v4063_v62, %v4062_v63  ;;  %v3866_v60 = vpack.c.bf16 %v3179_v55, %v3178_v54 }
 0x2fb   : > { %v4605_v3 = vpop.eup %4205  ;;  %v805_v4 = vsel %vm412_vm2, %v4603_v0, 0.0 }
 0x2fc   : > { %806 = vadd.xlane.f32.xlu1 %v805_v4  ;;  %v802_v14 = vsel %vm412_vm2, %v4605_v3, 0.0  ;;  %3847 = vmatprep.subr.bf16.mxu0 %v3846_v2 }
 0x2fd   : > { %803 = vadd.xlane.f32.xlu0 %v802_v14  ;;  %3849 = vmatpush3.bf16.msra.mxu0 %v3846_v2 }
 0x2fe   : > { %v4611_v15 = vpop.eup %4207 }
 0x2ff   : > { %v4613_v17 = vpop.eup %4209  ;;  %v811_v16 = vsel %vm412_vm2, %v4611_v15, 0.0 }
 0x300   : > { %812 = vadd.xlane.f32.xlu1 %v811_v16  ;;  %v808_v20 = vsel %vm412_vm2, %v4613_v17, 0.0 }
 0x301   : > { %809 = vadd.xlane.f32.xlu0 %v808_v20 }
 0x302   : > { %v4619_v22 = vpop.eup %4211 }
 0x303   : > { %v817_v23 = vsel %vm412_vm2, %v4619_v22, 0.0  ;;  %v4623_v25 = vpop.eup %4213 }
 0x304   : > { %818 = vadd.xlane.f32.xlu1 %v817_v23  ;;  %v814_v26 = vsel %vm412_vm2, %v4623_v25, 0.0 }
 0x308   : > { %815 = vadd.xlane.f32.xlu1 %v814_v26  ;;  %v3181_v26 = vld [vmem:[%s5184_s4 + $0x1] ss:$0 sm:$0xff] }
 0x317   : > { %4070 = vrot.lane.b32.xlu0 %v4490_v29, %s4346_s25 }
 0x319   : > { %4065 = vrot.lane.b32.xlu1 %v4480_v24, %s4346_s25 }
 0x31b   : > { %4075 = vrot.lane.b32.xlu0 %v4500_v34, %s4346_s25 }
 0x384   : > { %v801_v27 = vpop.xlane.xlu1 %800 }
 0x385   : > { %v798_v28 = vpop.xlane.xlu0 %797 }
 0x386   : > { %4215 = vrcp.f32 %v798_v28 }
 0x387   : > { %4217 = vrcp.f32 %v801_v27 }
 0x389   : > { %v807_v30 = vpop.xlane.xlu1 %806 }
 0x38a   : > { %v804_v31 = vpop.xlane.xlu0 %803 }
 0x38b   : > { %4219 = vrcp.f32 %v804_v31 }
 0x38c   : > { %4221 = vrcp.f32 %v807_v30 }
 0x38d   : > { %v813_v32 = vpop.xlane.xlu1 %812 }
 0x38e   : > { %v810_v33 = vpop.xlane.xlu0 %809 }
 0x38f   : > { %4223 = vrcp.f32 %v810_v33 }
 0x390   : > { %v4216_v35 = vpop.eup %4215  ;;  %4225 = vrcp.f32 %v813_v32 }
 0x391   : > { %v819_v36 = vpop.xlane.xlu1 %818  ;;  %v828_v37 = vmul.f32 %v4216_v35, %v4202_v53  ;;  %v4218_v53 = vpop.eup %4217 }
 0x392   : > { %v4071_v38 = vpop.permute.xlu0 %4070  ;;  %v829_v59 = vmul.f32 %v4218_v53, %v4598_v52 }
 0x393   : > { %3554 = vmatprep.mubr.msk.f32.mxu0 %vm412_vm2, %v828_v37  ;;  %v4073_v40 = vunpack.i.h.bf16 %v4071_v38  ;;  %v4072_v24 = vunpack.i.l.bf16 %v4071_v38 }
 0x395   : > { %v816_v29 = vpop.xlane.xlu1 %815  ;;  %v3854_v45 = vpack.c.bf16 %v4073_v40, %v4072_v24  ;;  %v4220_v58 = vpop.eup %4219 }
 0x396   : > { %v4076_v34 = vpop.permute.xlu0 %4075  ;;  %4227 = vrcp.f32 %v816_v29  ;;  %v4222_v62 = vpop.eup %4221  ;;  %v830_v63 = vmul.f32 %v4220_v58, %v4605_v3 }
 0x397   : > { %v4078_v44 = vunpack.i.h.bf16 %v4076_v34  ;;  %v4077_v19 = vunpack.i.l.bf16 %v4076_v34  ;;  %4229 = vrcp.f32 %v819_v36  ;;  %v831_v4 = vmul.f32 %v4222_v62, %v4603_v0 }
 0x399   : > { %v4066_v39 = vpop.permute.xlu1 %4065  ;;  %v3858_v50 = vpack.c.bf16 %v4078_v44, %v4077_v19  ;;  %v4224_v2 = vpop.eup %4223 }
 0x39a   : > { %v4068_v41 = vunpack.i.h.bf16 %v4066_v39  ;;  %v4067_v42 = vunpack.i.l.bf16 %v4066_v39  ;;  %v4226_v14 = vpop.eup %4225  ;;  %v832_v16 = vmul.f32 %v4224_v2, %v4613_v17 }
 0x39b   : > { %v833_v52 = vmul.f32 %v4226_v14, %v4611_v15 }
 0x39c   : > { %v3850_v43 = vpack.c.bf16 %v4068_v41, %v4067_v42 }
 0x39e   : > { %3851 = vmatprep.subr.bf16.mxu0 %v3850_v43 }
 0x39f   : > { %3853 = vmatpush3.bf16.msra.mxu0 %v3850_v43 }
 0x3a0   : > { %3855 = vmatprep.subr.bf16.mxu0 %v3854_v45  ;;  %v4228_v20 = vpop.eup %4227 }
 0x3a1   : > { %v4230_v3 = vpop.eup %4229  ;;  %v834_v23 = vmul.f32 %v4228_v20, %v4623_v25 }
 0x3a2   : > { %v835_v0 = vmul.f32 %v4230_v3, %v4619_v22 }
 0x3a3   : > { %3857 = vmatpush3.bf16.msra.mxu0 %v3854_v45 }
 0x3a4   : > { %3859 = vmatprep.subr.bf16.mxu0 %v3858_v50 }
 0x3a7   : > { %3861 = vmatpush3.bf16.msra.mxu0 %v3858_v50 }
 0x3a8   : > { %3863 = vmatprep.subr.bf16.mxu0 %v3862_v51 }
 0x3aa   : > { %3555 = vmatmul.mubr.msk.f32.vlgmr.msra.gmra.mrb[8].mxu0 %vm412_vm2, %v829_v59 }
 0x3ab   : > { %3557 = vmatprep.mubr.msk.f32.mxu0 %vm412_vm2, %v830_v63  ;;  %3865 = vmatpush3.bf16.msra.mxu0 %v3862_v51 }
 0x3ac   : > { %3867 = vmatprep.subr.bf16.mxu0 %v3866_v60 }
 0x3ae   : > { %3558 = vmatmul.mubr.msk.f32.gmra.mrb[10].mxu0 %vm412_vm2, %v831_v4 }
 0x3af   : > { %3560 = vmatprep.mubr.msk.f32.mxu0 %vm412_vm2, %v832_v16  ;;  %3869 = vmatpush3.bf16.msra.mxu0 %v3866_v60 }
 0x3b2   : > { %3561 = vmatmul.mubr.msk.f32.gmra.mrb[12].mxu0 %vm412_vm2, %v833_v52 }
 0x3b3   : > { %3563 = vmatprep.mubr.msk.f32.mxu0 %vm412_vm2, %v834_v23 }
 0x3b6   : > { %3564 = vmatmul.mubr.msk.f32.gmra.mrb[14].mxu0 %vm412_vm2, %v835_v0 }
 0x3b7   : > { %3574 = vmatprep.mubr.msk.f32.mxu0 %vm440_vm0, %v4424_v6 }
 0x3ba   : > { %3575 = vmatmul.mubr.msk.f32.vlgmr.msra.gmra.mrb[16].mxu0 %vm440_vm0, %v4429_v7 }
 0x3bb   : > { %3577 = vmatprep.mubr.msk.f32.mxu0 %vm440_vm0, %v4432_v8 }
 0x3be   : > { %3578 = vmatmul.mubr.msk.f32.gmra.mrb[18].mxu0 %vm440_vm0, %v4439_v9 }
 0x3bf   : > { %3580 = vmatprep.mubr.msk.f32.mxu0 %vm440_vm0, %v4442_v10 }
 0x3c2   : > { %3581 = vmatmul.mubr.msk.f32.gmra.mrb[20].mxu0 %vm440_vm0, %v4449_v11 }
 0x3c3   : > { %3583 = vmatprep.mubr.msk.f32.mxu0 %vm440_vm0, %v4452_v12 }
 0x3c6   : > { %3584 = vmatmul.mubr.msk.f32.gmra.mrb[22].mxu0 %vm440_vm0, %v4459_v13 }
 0x47d   : > { %v3556_v6 = vpop.f32.mrb[8].mxu0 }
 0x47e   : > { %990 = vst.msk [vmem:[#allocation3 + $0x8] sm:$0xff] %vm594_vm1, %v3556_v6  ;;  %v950_v7 = vpop.f32.mrb[9].mxu0 }
 0x47f   : > { %989 = vst.msk [vmem:[#allocation3] sm:$0xff] %vm594_vm1, %v950_v7 }
 0x481   : > { %v3559_v8 = vpop.f32.mrb[10].mxu0 }
 0x482   : > { %992 = vst.msk [vmem:[#allocation3 + $0x18] sm:$0xff] %vm594_vm1, %v3559_v8  ;;  %v960_v9 = vpop.f32.mrb[11].mxu0 }
 0x483   : > { %991 = vst.msk [vmem:[#allocation3 + $0x10] sm:$0xff] %vm594_vm1, %v960_v9 }
 0x485   : > { %v3562_v10 = vpop.f32.mrb[12].mxu0  ;;  %v2729_v11 = vld [vmem:[#allocation3 + $0x8] sm:$0xff] }
 0x486   : > { %994 = vst.msk [vmem:[#allocation3 + $0x28] sm:$0xff] %vm594_vm1, %v3562_v10  ;;  %v970_v12 = vpop.f32.mrb[13].mxu0  ;;  %2737 = vst.msk [vmem:[#allocation4 + $0x8] sm:$0xff] %vm594_vm1, %v2729_v11  ;;  %v2728_v13 = vld [vmem:[#allocation3] sm:$0xff] }
 0x487   : > { %993 = vst.msk [vmem:[#allocation3 + $0x20] sm:$0xff] %vm594_vm1, %v970_v12  ;;  %2736 = vst.msk [vmem:[#allocation4] sm:$0xff] %vm594_vm1, %v2728_v13 }
 0x489   : > { %v3565_v15 = vpop.f32.mrb[14].mxu0  ;;  %v2731_v17 = vld [vmem:[#allocation3 + $0x18] sm:$0xff] }
 0x48a   : > { %996 = vst.msk [vmem:[#allocation3 + $0x38] sm:$0xff] %vm594_vm1, %v3565_v15  ;;  %v980_v22 = vpop.f32.mrb[15].mxu0  ;;  %2739 = vst.msk [vmem:[#allocation4 + $0x18] sm:$0xff] %vm594_vm1, %v2731_v17  ;;  %v2730_v25 = vld [vmem:[#allocation3 + $0x10] sm:$0xff] }
 0x48b   : > { %995 = vst.msk [vmem:[#allocation3 + $0x30] sm:$0xff] %vm594_vm1, %v980_v22  ;;  %2738 = vst.msk [vmem:[#allocation4 + $0x10] sm:$0xff] %vm594_vm1, %v2730_v25 }
 0x48d   : > { %v3576_v27 = vpop.f32.mrb[16].mxu0  ;;  %v2733_v28 = vld [vmem:[#allocation3 + $0x28] sm:$0xff] }
 0x48e   : > { %v1114_v30 = vadd.f32 %v3576_v27, %v3181_v26  ;;  %v1108_v31 = vpop.f32.mrb[17].mxu0  ;;  %2741 = vst.msk [vmem:[#allocation4 + $0x28] sm:$0xff] %vm594_vm1, %v2733_v28  ;;  %v2732_v32 = vld [vmem:[#allocation3 + $0x20] sm:$0xff] }
 0x48f   : > { %v1109_v33 = vadd.f32 %v3181_v26, %v1108_v31  ;;  %2740 = vst.msk [vmem:[#allocation4 + $0x20] sm:$0xff] %vm594_vm1, %v2732_v32 }
 0x491   : > { %3602 = vmatprep.mubr.msk.f32.mxu1 %vm594_vm1, %v1109_v33  ;;  %v4694_v35 = vpack.i.bf16 %v1114_v30, %v1109_v33  ;;  %v3579_v36 = vpop.f32.mrb[18].mxu0  ;;  %v2735_v37 = vld [vmem:[#allocation3 + $0x38] sm:$0xff] }
 0x492   : > { %v1124_v38 = vadd.f32 %v3579_v36, %v3181_v26  ;;  %v1118_v29 = vpop.f32.mrb[19].mxu0  ;;  %2743 = vst.msk [vmem:[#allocation4 + $0x38] sm:$0xff] %vm594_vm1, %v2735_v37  ;;  %v2734_v39 = vld [vmem:[#allocation3 + $0x30] sm:$0xff] }
 0x493   : > { %4080 = vrot.lane.b32.xlu1 %v4694_v35, %s4343_s18  ;;  %v1119_v40 = vadd.f32 %v3181_v26, %v1118_v29  ;;  %2742 = vst.msk [vmem:[#allocation4 + $0x30] sm:$0xff] %vm594_vm1, %v2734_v39 }
 0x495   : > { %v4700_v24 = vpack.i.bf16 %v1124_v38, %v1119_v40  ;;  %v3582_v41 = vpop.f32.mrb[20].mxu0 }
 0x496   : > { %v1134_v42 = vadd.f32 %v3582_v41, %v3181_v26  ;;  %v1128_v34 = vpop.f32.mrb[21].mxu0 }
 0x497   : > { %4085 = vrot.lane.b32.xlu0 %v4700_v24, %s4343_s18  ;;  %v1129_v43 = vadd.f32 %v3181_v26, %v1128_v34 }
 0x499   : > { %v4704_v44 = vpack.i.bf16 %v1134_v42, %v1129_v43  ;;  %v3585_v19 = vpop.f32.mrb[22].mxu0 }
 0x49a   : > { %v1144_v45 = vadd.f32 %v3585_v19, %v3181_v26  ;;  %v1138_v46 = vpop.f32.mrb[23].mxu0 }
 0x49b   : > { %4090 = vrot.lane.b32.xlu1 %v4704_v44, %s4343_s18  ;;  %v1139_v47 = vadd.f32 %v3181_v26, %v1138_v46 }
 0x49d   : > { %v4708_v50 = vpack.i.bf16 %v1144_v45, %v1139_v47 }
 0x49f   : > { %4095 = vrot.lane.b32.xlu0 %v4708_v50, %s4343_s18 }
 0x505   : > { %v4081_v51 = vpop.permute.xlu1 %4080 }
 0x506   : > { %v4083_v53 = vunpack.i.h.bf16 %v4081_v51  ;;  %v4082_v54 = vunpack.i.l.bf16 %v4081_v51 }
 0x508   : > { %v3870_v55 = vpack.c.bf16 %v4083_v53, %v4082_v54 }
 0x509   : > { %v4086_v58 = vpop.permute.xlu0 %4085 }
 0x50a   : > { %3872 = vmatprep.subr.msk.bf16.mxu1 %vm4514_vm11, %v3870_v55  ;;  %v4088_v59 = vunpack.i.h.bf16 %v4086_v58  ;;  %v4087_v60 = vunpack.i.l.bf16 %v4086_v58 }
 0x50b   : > { %3875 = vmatpush3.bf16.xpose.msk.msra.mxu1 %vm4514_vm11, %v3870_v55 }
 0x50c   : > { %v3876_v62 = vpack.c.bf16 %v4088_v59, %v4087_v60 }
 0x50d   : > { %v4091_v63 = vpop.permute.xlu1 %4090 }
 0x50e   : > { %3878 = vmatprep.subr.msk.bf16.mxu1 %vm4514_vm11, %v3876_v62  ;;  %v4093_v2 = vunpack.i.h.bf16 %v4091_v63  ;;  %v4092_v4 = vunpack.i.l.bf16 %v4091_v63 }
 0x510   : > { %v3882_v14 = vpack.c.bf16 %v4093_v2, %v4092_v4 }
 0x511   : > { %v4096_v16 = vpop.permute.xlu0 %4095 }
 0x512   : > { %v4098_v20 = vunpack.i.h.bf16 %v4096_v16  ;;  %v4097_v52 = vunpack.i.l.bf16 %v4096_v16 }
 0x513   : > { %3881 = vmatpush3.bf16.xpose.msk.msra.mxu1 %vm4514_vm11, %v3876_v62 }
 0x514   : > { %3884 = vmatprep.subr.msk.bf16.mxu1 %vm4514_vm11, %v3882_v14  ;;  %v3888_v3 = vpack.c.bf16 %v4098_v20, %v4097_v52 }
 0x51b   : > { %3887 = vmatpush3.bf16.xpose.msk.msra.mxu1 %vm4514_vm11, %v3882_v14 }
 0x51c   : > { %3890 = vmatprep.subr.msk.bf16.mxu1 %vm4514_vm11, %v3888_v3 }
 0x523   : > { %3893 = vmatpush3.bf16.xpose.msk.msra.mxu1 %vm4514_vm11, %v3888_v3 }
 0x52a   : > { %3603 = vmatmul.mubr.msk.f32.vlgmr.msra.gmra.mrb[8].mxu1 %vm594_vm1, %v1114_v30 }
 0x52b   : > { %3605 = vmatprep.mubr.msk.f32.mxu1 %vm594_vm1, %v1119_v40 }
 0x52e   : > { %3606 = vmatmul.mubr.msk.f32.gmra.mrb[10].mxu1 %vm594_vm1, %v1124_v38 }
 0x52f   : > { %3608 = vmatprep.mubr.msk.f32.mxu1 %vm594_vm1, %v1129_v43 }
 0x532   : > { %3609 = vmatmul.mubr.msk.f32.gmra.mrb[12].mxu1 %vm594_vm1, %v1134_v42 }
 0x533   : > { %3611 = vmatprep.mubr.msk.f32.mxu1 %vm594_vm1, %v1139_v47 }
 0x536   : > { %3612 = vmatmul.mubr.msk.f32.gmra.mrb[14].mxu1 %vm594_vm1, %v1144_v45 }
 0x5fd   : > { %v3604_v23 = vpop.f32.mrb[8].mxu1 }
 0x5fe   : > { %v1317_v0 = vmul.f32 %v3604_v23, %v4564_v48  ;;  %v1269_v6 = vpop.f32.mrb[9].mxu1 }
 0x5ff   : > { %v1316_v7 = vmul.f32 %v1269_v6, %v4566_v49 }
 0x600   : > { %v1327_v8 = vsel %vm412_vm2, %v1317_v0, -inf }
 0x601   : > { %1328 = vmax.xlane.f32.xlu0 %v1327_v8  ;;  %v3607_v9 = vpop.f32.mrb[10].mxu1  ;;  %v1324_v10 = vsel %vm412_vm2, %v1316_v7, -inf }
 0x602   : > { %v1319_v11 = vmul.f32 %v3607_v9, %v4571_v56  ;;  %1325 = vmax.xlane.f32.xlu1 %v1324_v10  ;;  %v1279_v12 = vpop.f32.mrb[11].mxu1 }
 0x603   : > { %v1318_v13 = vmul.f32 %v1279_v12, %v4575_v61 }
 0x604   : > { %v1333_v15 = vsel %vm412_vm2, %v1319_v11, -inf }
 0x605   : > { %v3610_v17 = vpop.f32.mrb[12].mxu1  ;;  %v1330_v48 = vsel %vm412_vm2, %v1318_v13, -inf }
 0x606   : > { %v1321_v22 = vmul.f32 %v3610_v17, %v4579_v1  ;;  %1334 = vmax.xlane.f32.xlu1 %v1333_v15  ;;  %1331 = vmax.xlane.f32.xlu0 %v1330_v48  ;;  %v1289_v49 = vpop.f32.mrb[13].mxu1 }
 0x607   : > { %v1320_v25 = vmul.f32 %v1289_v49, %v4583_v5 }
 0x608   : > { %v1339_v26 = vsel %vm412_vm2, %v1321_v22, -inf }
 0x609   : > { %v3613_v27 = vpop.f32.mrb[14].mxu1  ;;  %v1336_v56 = vsel %vm412_vm2, %v1320_v25, -inf }
 0x60a   : > { %v1323_v28 = vmul.f32 %v3613_v27, %v4587_v18  ;;  %1340 = vmax.xlane.f32.xlu1 %v1339_v26  ;;  %1337 = vmax.xlane.f32.xlu0 %v1336_v56  ;;  %v1299_v61 = vpop.f32.mrb[15].mxu1 }
 0x60b   : > { %v1322_v30 = vmul.f32 %v1299_v61, %v4591_v21 }
 0x60c   : > { %v1345_v31 = vsel %vm412_vm2, %v1323_v28, -inf }
 0x60d   : > { %v1342_v1 = vsel %vm412_vm2, %v1322_v30, -inf }
 0x60e   : > { %1346 = vmax.xlane.f32.xlu1 %v1345_v31  ;;  %1343 = vmax.xlane.f32.xlu0 %v1342_v1 }
 0x624   : > { %4100 = vrot.lane.b32.xlu0 %v4694_v35, %s4346_s25 }
 0x68e   : > { %v1329_v5 = vpop.xlane.xlu0 %1328 }
 0x68f   : > { %v1349_v32 = vsub.f32 %v1317_v0, %v1329_v5  ;;  %v1326_v33 = vpop.xlane.xlu1 %1325 }
 0x690   : > { %v1348_v36 = vsub.f32 %v1316_v7, %v1326_v33  ;;  %v3214_v33 = vld [vmem:[%s5183_s3 + $0x40] sm:$0xff] }
 0x691   : > { %v1358_v37 = vmul.f32 1.442695, %v1349_v32 }
 0x692   : > { %v1356_v18 = vmul.f32 1.442695, %v1348_v36  ;;  %v3215_v36 = vld [vmem:[%s5183_s3 + $0x48] sm:$0xff] }
 0x693   : > { %4231 = vpow2.f32 %v1358_v37  ;;  %v1335_v38 = vpop.xlane.xlu1 %1334  ;;  %v1332_v29 = vpop.xlane.xlu0 %1331 }
 0x694   : > { %4233 = vpow2.f32 %v1356_v18  ;;  %v1351_v21 = vsub.f32 %v1319_v11, %v1335_v38  ;;  %v1350_v39 = vsub.f32 %v1318_v13, %v1332_v29  ;;  %v3910_v18 = vpack.c.bf16 %v3215_v36, %v3214_v33  ;;  %v3216_v29 = vld [vmem:[%s5183_s3 + $0x50] sm:$0xff] }
 0x696   : > { %v1362_v40 = vmul.f32 1.442695, %v1351_v21  ;;  %v1360_v41 = vmul.f32 1.442695, %v1350_v39  ;;  %v3217_v21 = vld [vmem:[%s5183_s3 + $0x58] sm:$0xff] }
 0x697   : > { %v1341_v42 = vpop.xlane.xlu1 %1340  ;;  %v1338_v34 = vpop.xlane.xlu0 %1337 }
 0x698   : > { %4235 = vpow2.f32 %v1362_v40  ;;  %v1353_v43 = vsub.f32 %v1321_v22, %v1341_v42  ;;  %v1352_v19 = vsub.f32 %v1320_v25, %v1338_v34 }
 0x699   : > { %4237 = vpow2.f32 %v1360_v41  ;;  %v3914_v41 = vpack.c.bf16 %v3217_v21, %v3216_v29 }
 0x69a   : > { %v1366_v35 = vmul.f32 1.442695, %v1353_v43  ;;  %v1364_v45 = vmul.f32 1.442695, %v1352_v19 }
 0x69b   : > { %v1347_v46 = vpop.xlane.xlu1 %1346  ;;  %v1344_v47 = vpop.xlane.xlu0 %1343 }
 0x69c   : > { %4239 = vpow2.f32 %v1366_v35  ;;  %v1355_v51 = vsub.f32 %v1323_v28, %v1347_v46  ;;  %v1354_v53 = vsub.f32 %v1322_v30, %v1344_v47 }
 0x69d   : > { %v4753_v54 = vpop.eup %4231  ;;  %4241 = vpow2.f32 %v1364_v45 }
 0x69e   : > { %v4234_v55 = vpop.eup %4233  ;;  %v1370_v58 = vmul.f32 1.442695, %v1355_v51  ;;  %v1368_v59 = vmul.f32 1.442695, %v1354_v53  ;;  %v1375_v60 = vsel %vm412_vm2, %v4753_v54, 0.0 }
 0x69f   : > { %1376 = vadd.xlane.f32.xlu1 %v1375_v60  ;;  %v4101_v62 = vpop.permute.xlu0 %4100  ;;  %v1372_v63 = vsel %vm412_vm2, %v4234_v55, 0.0  ;;  %v4831_v60 = vld [vmem:[%s4421_s15 + $0x18] sm:$0xff] }
 0x6a0   : > { %4243 = vpow2.f32 %v1370_v58  ;;  %v4103_v2 = vunpack.i.h.bf16 %v4101_v62  ;;  %v4102_v4 = vunpack.i.l.bf16 %v4101_v62  ;;  %1373 = vadd.xlane.f32.xlu0 %v1372_v63  ;;  %v4821_v58 = vld [vmem:[%s4421_s15 + $0x8] sm:$0xff]  ;;  %v4834_v62 = vld [vmem:[%s4421_s15 + $0x20] sm:$0xff] }
 0x6a1   : > { %4245 = vpow2.f32 %v1368_v59  ;;  %v4824_v59 = vld [vmem:[%s4421_s15 + $0x10] sm:$0xff]  ;;  %v4841_v63 = vld [vmem:[%s4421_s15 + $0x28] sm:$0xff] }
 0x6a2   : > { %v4758_v14 = vpop.eup %4235  ;;  %v3894_v16 = vpack.c.bf16 %v4103_v2, %v4102_v4  ;;  %v4844_v2 = vld [vmem:[%s4421_s15 + $0x30] sm:$0xff]  ;;  %v4851_v4 = vld [vmem:[%s4421_s15 + $0x38] sm:$0xff] }
 0x6a3   : > { %v4760_v20 = vpop.eup %4237  ;;  %v1381_v52 = vsel %vm412_vm2, %v4758_v14, 0.0 }
 0x6a4   : > { %1382 = vadd.xlane.f32.xlu1 %v1381_v52  ;;  %v1378_v3 = vsel %vm412_vm2, %v4760_v20, 0.0  ;;  %3895 = vmatprep.subr.bf16.mxu0 %v3894_v16 }
 0x6a5   : > { %1379 = vadd.xlane.f32.xlu0 %v1378_v3  ;;  %3897 = vmatpush3.bf16.msra.mxu0 %v3894_v16 }
 0x6a6   : > { %v4766_v23 = vpop.eup %4239 }
 0x6a7   : > { %v4768_v0 = vpop.eup %4241  ;;  %v1387_v6 = vsel %vm412_vm2, %v4766_v23, 0.0 }
 0x6a8   : > { %1388 = vadd.xlane.f32.xlu1 %v1387_v6  ;;  %v1384_v7 = vsel %vm412_vm2, %v4768_v0, 0.0 }
 0x6a9   : > { %1385 = vadd.xlane.f32.xlu0 %v1384_v7  ;;  %v3219_v7 = vld [vmem:[%s5184_s4 + $0x2] ss:$0 sm:$0xff] }
 0x6aa   : > { %v4774_v8 = vpop.eup %4243 }
 0x6ab   : > { %v1393_v9 = vsel %vm412_vm2, %v4774_v8, 0.0  ;;  %v4778_v10 = vpop.eup %4245 }
 0x6ac   : > { %1394 = vadd.xlane.f32.xlu1 %v1393_v9  ;;  %v1390_v11 = vsel %vm412_vm2, %v4778_v10, 0.0 }
 0x6b0   : > { %1391 = vadd.xlane.f32.xlu1 %v1390_v11 }
 0x6bf   : > { %4110 = vrot.lane.b32.xlu0 %v4704_v44, %s4346_s25 }
 0x6c1   : > { %4105 = vrot.lane.b32.xlu1 %v4700_v24, %s4346_s25 }
 0x6c3   : > { %4115 = vrot.lane.b32.xlu0 %v4708_v50, %s4346_s25 }
 0x72c   : > { %v1377_v12 = vpop.xlane.xlu1 %1376 }
 0x72d   : > { %v1374_v13 = vpop.xlane.xlu0 %1373 }
 0x72e   : > { %4247 = vrcp.f32 %v1374_v13 }
 0x72f   : > { %4249 = vrcp.f32 %v1377_v12 }
 0x731   : > { %v1383_v15 = vpop.xlane.xlu1 %1382 }
 0x732   : > { %v1380_v17 = vpop.xlane.xlu0 %1379 }
 0x733   : > { %4251 = vrcp.f32 %v1380_v17 }
 0x734   : > { %4253 = vrcp.f32 %v1383_v15 }
 0x735   : > { %v1389_v48 = vpop.xlane.xlu1 %1388 }
 0x736   : > { %v1386_v22 = vpop.xlane.xlu0 %1385 }
 0x737   : > { %4255 = vrcp.f32 %v1386_v22 }
 0x738   : > { %v4248_v49 = vpop.eup %4247  ;;  %4257 = vrcp.f32 %v1389_v48 }
 0x739   : > { %v1395_v25 = vpop.xlane.xlu1 %1394  ;;  %v1404_v26 = vmul.f32 %v4248_v49, %v4234_v55  ;;  %v4250_v38 = vpop.eup %4249  ;;  %v4815_v55 = vld [vmem:[%s4421_s15] sm:$0xff] }
 0x73a   : > { %v4111_v27 = vpop.permute.xlu0 %4110  ;;  %v1405_v40 = vmul.f32 %v4250_v38, %v4753_v54 }
 0x73b   : > { %3630 = vmatprep.mubr.msk.f32.mxu0 %vm412_vm2, %v1404_v26  ;;  %v4113_v28 = vunpack.i.h.bf16 %v4111_v27  ;;  %v4112_v24 = vunpack.i.l.bf16 %v4111_v27 }
 0x73d   : > { %v1392_v44 = vpop.xlane.xlu1 %1391  ;;  %v3902_v1 = vpack.c.bf16 %v4113_v28, %v4112_v24  ;;  %v4252_v39 = vpop.eup %4251 }
 0x73e   : > { %v4116_v50 = vpop.permute.xlu0 %4115  ;;  %4259 = vrcp.f32 %v1392_v44  ;;  %v4254_v42 = vpop.eup %4253  ;;  %v1406_v34 = vmul.f32 %v4252_v39, %v4760_v20 }
 0x73f   : > { %v4118_v5 = vunpack.i.h.bf16 %v4116_v50  ;;  %v4117_v32 = vunpack.i.l.bf16 %v4116_v50  ;;  %4261 = vrcp.f32 %v1395_v25  ;;  %v1407_v19 = vmul.f32 %v4254_v42, %v4758_v14 }
 0x741   : > { %v4106_v56 = vpop.permute.xlu1 %4105  ;;  %v3906_v37 = vpack.c.bf16 %v4118_v5, %v4117_v32  ;;  %v4256_v43 = vpop.eup %4255 }
 0x742   : > { %v4108_v61 = vunpack.i.h.bf16 %v4106_v56  ;;  %v4107_v30 = vunpack.i.l.bf16 %v4106_v56  ;;  %v4258_v35 = vpop.eup %4257  ;;  %v1408_v45 = vmul.f32 %v4256_v43, %v4768_v0  ;;  %v4327_v43 = vld [vmem:[#allocation2 + $0x8] sm:$0xff] }
 0x743   : > { %v1409_v47 = vmul.f32 %v4258_v35, %v4766_v23 }
 0x744   : > { %v3898_v31 = vpack.c.bf16 %v4108_v61, %v4107_v30 }
 0x746   : > { %3899 = vmatprep.subr.bf16.mxu0 %v3898_v31 }
 0x747   : > { %3901 = vmatpush3.bf16.msra.mxu0 %v3898_v31 }
 0x748   : > { %3903 = vmatprep.subr.bf16.mxu0 %v3902_v1  ;;  %v4260_v46 = vpop.eup %4259 }
 0x749   : > { %v4262_v51 = vpop.eup %4261  ;;  %v1410_v53 = vmul.f32 %v4260_v46, %v4778_v10 }
 0x74a   : > { %v1411_v54 = vmul.f32 %v4262_v51, %v4774_v8 }
 0x74b   : > { %3905 = vmatpush3.bf16.msra.mxu0 %v3902_v1 }
 0x74c   : > { %3907 = vmatprep.subr.bf16.mxu0 %v3906_v37 }
 0x74f   : > { %3909 = vmatpush3.bf16.msra.mxu0 %v3906_v37 }
 0x750   : > { %3911 = vmatprep.subr.bf16.mxu0 %v3910_v18 }
 0x752   : > { %3631 = vmatmul.mubr.msk.f32.vlgmr.msra.gmra.mrb[24].mxu0 %vm412_vm2, %v1405_v40 }
 0x753   : > { %3633 = vmatprep.mubr.msk.f32.mxu0 %vm412_vm2, %v1406_v34  ;;  %3913 = vmatpush3.bf16.msra.mxu0 %v3910_v18 }
 0x754   : > { %3915 = vmatprep.subr.bf16.mxu0 %v3914_v41 }
 0x756   : > { %3634 = vmatmul.mubr.msk.f32.gmra.mrb[26].mxu0 %vm412_vm2, %v1407_v19 }
 0x757   : > { %3636 = vmatprep.mubr.msk.f32.mxu0 %vm412_vm2, %v1408_v45  ;;  %3917 = vmatpush3.bf16.msra.mxu0 %v3914_v41  ;;  %v4328_v45 = vld [vmem:[#allocation2] sm:$0xff] }
 0x75a   : > { %3637 = vmatmul.mubr.msk.f32.gmra.mrb[28].mxu0 %vm412_vm2, %v1409_v47 }
 0x75b   : > { %3639 = vmatprep.mubr.msk.f32.mxu0 %vm412_vm2, %v1410_v53 }
 0x75e   : > { %3640 = vmatmul.mubr.msk.f32.gmra.mrb[30].mxu0 %vm412_vm2, %v1411_v54  ;;  %v4329_v54 = vld [vmem:[#allocation2 + $0x18] sm:$0xff] }
 0x75f   : > { %3650 = vmatprep.mubr.msk.f32.mxu0 %vm440_vm0, %v4815_v55 }
 0x762   : > { %3651 = vmatmul.mubr.msk.f32.vlgmr.msra.gmra.mrb[32].mxu0 %vm440_vm0, %v4821_v58 }
 0x763   : > { %3653 = vmatprep.mubr.msk.f32.mxu0 %vm440_vm0, %v4824_v59 }
 0x766   : > { %3654 = vmatmul.mubr.msk.f32.gmra.mrb[34].mxu0 %vm440_vm0, %v4831_v60 }
 0x767   : > { %3656 = vmatprep.mubr.msk.f32.mxu0 %vm440_vm0, %v4834_v62 }
 0x76a   : > { %3657 = vmatmul.mubr.msk.f32.gmra.mrb[36].mxu0 %vm440_vm0, %v4841_v63 }
 0x76b   : > { %3659 = vmatprep.mubr.msk.f32.mxu0 %vm440_vm0, %v4844_v2 }
 0x76e   : > { %3660 = vmatmul.mubr.msk.f32.gmra.mrb[38].mxu0 %vm440_vm0, %v4851_v4 }
 0x825   : > { %v3632_v14 = vpop.f32.mrb[24].mxu0 }
 0x826   : > { %1567 = vst.msk [vmem:[#allocation3 + $0x48] sm:$0xff] %vm594_vm1, %v3632_v14  ;;  %v1526_v16 = vpop.f32.mrb[25].mxu0 }
 0x827   : > { %1566 = vst.msk [vmem:[#allocation3 + $0x40] sm:$0xff] %vm594_vm1, %v1526_v16 }
 0x829   : > { %v3635_v20 = vpop.f32.mrb[26].mxu0 }
 0x82a   : > { %1569 = vst.msk [vmem:[#allocation3 + $0x58] sm:$0xff] %vm594_vm1, %v3635_v20  ;;  %v1536_v52 = vpop.f32.mrb[27].mxu0  ;;  %v4330_v20 = vld [vmem:[#allocation2 + $0x10] sm:$0xff] }
 0x82b   : > { %1568 = vst.msk [vmem:[#allocation3 + $0x50] sm:$0xff] %vm594_vm1, %v1536_v52 }
 0x82d   : > { %v3638_v3 = vpop.f32.mrb[28].mxu0 }
 0x82e   : > { %1571 = vst.msk [vmem:[#allocation3 + $0x68] sm:$0xff] %vm594_vm1, %v3638_v3  ;;  %v1546_v23 = vpop.f32.mrb[29].mxu0 }
 0x82f   : > { %1570 = vst.msk [vmem:[#allocation3 + $0x60] sm:$0xff] %vm594_vm1, %v1546_v23 }
 0x831   : > { %v3641_v0 = vpop.f32.mrb[30].mxu0 }
 0x832   : > { %1573 = vst.msk [vmem:[#allocation3 + $0x78] sm:$0xff] %vm594_vm1, %v3641_v0  ;;  %v1556_v6 = vpop.f32.mrb[31].mxu0 }
 0x833   : > { %1572 = vst.msk [vmem:[#allocation3 + $0x70] sm:$0xff] %vm594_vm1, %v1556_v6  ;;  %v4331_v6 = vld [vmem:[#allocation2 + $0x28] sm:$0xff] }
 0x835   : > { %v3652_v8 = vpop.f32.mrb[32].mxu0 }
 0x836   : > { %v1691_v9 = vadd.f32 %v3652_v8, %v3219_v7  ;;  %v1685_v10 = vpop.f32.mrb[33].mxu0 }
 0x837   : > { %v1686_v11 = vadd.f32 %v3219_v7, %v1685_v10 }
 0x839   : > { %3678 = vmatprep.mubr.msk.f32.mxu1 %vm594_vm1, %v1686_v11  ;;  %v4867_v12 = vpack.i.bf16 %v1691_v9, %v1686_v11  ;;  %v3655_v13 = vpop.f32.mrb[34].mxu0 }
 0x83a   : > { %v1701_v15 = vadd.f32 %v3655_v13, %v3219_v7  ;;  %v1695_v17 = vpop.f32.mrb[35].mxu0 }
 0x83b   : > { %4120 = vrot.lane.b32.xlu1 %v4867_v12, %s4343_s18  ;;  %v1696_v48 = vadd.f32 %v3219_v7, %v1695_v17  ;;  %v4333_v17 = vld [vmem:[#allocation2 + $0x38] sm:$0xff] }
 0x83d   : > { %v4871_v22 = vpack.i.bf16 %v1701_v15, %v1696_v48  ;;  %v3658_v49 = vpop.f32.mrb[36].mxu0 }
 0x83e   : > { %v1711_v25 = vadd.f32 %v3658_v49, %v3219_v7  ;;  %v1705_v26 = vpop.f32.mrb[37].mxu0 }
 0x83f   : > { %4125 = vrot.lane.b32.xlu0 %v4871_v22, %s4343_s18  ;;  %v1706_v27 = vadd.f32 %v3219_v7, %v1705_v26 }
 0x841   : > { %v4875_v44 = vpack.i.bf16 %v1711_v25, %v1706_v27  ;;  %v3661_v56 = vpop.f32.mrb[38].mxu0 }
 0x842   : > { %v1721_v28 = vadd.f32 %v3661_v56, %v3219_v7  ;;  %v1715_v24 = vpop.f32.mrb[39].mxu0 }
 0x843   : > { %4130 = vrot.lane.b32.xlu1 %v4875_v44, %s4343_s18  ;;  %v1716_v61 = vadd.f32 %v3219_v7, %v1715_v24 }
 0x845   : > { %v4879_v30 = vpack.i.bf16 %v1721_v28, %v1716_v61 }
 0x847   : > { %4135 = vrot.lane.b32.xlu0 %v4879_v30, %s4343_s18 }
 0x8ad   : > { %v4121_v50 = vpop.permute.xlu1 %4120 }
 0x8ae   : > { %v4123_v31 = vunpack.i.h.bf16 %v4121_v50  ;;  %v4122_v1 = vunpack.i.l.bf16 %v4121_v50 }
 0x8b0   : > { %v3918_v5 = vpack.c.bf16 %v4123_v31, %v4122_v1 }
 0x8b1   : > { %v4126_v32 = vpop.permute.xlu0 %4125 }
 0x8b2   : > { %3920 = vmatprep.subr.msk.bf16.mxu1 %vm4514_vm11, %v3918_v5  ;;  %v4128_v33 = vunpack.i.h.bf16 %v4126_v32  ;;  %v4127_v36 = vunpack.i.l.bf16 %v4126_v32 }
 0x8b3   : > { %3923 = vmatpush3.bf16.xpose.msk.msra.mxu1 %vm4514_vm11, %v3918_v5 }
 0x8b4   : > { %v3924_v37 = vpack.c.bf16 %v4128_v33, %v4127_v36 }
 0x8b5   : > { %v4131_v18 = vpop.permute.xlu1 %4130 }
 0x8b6   : > { %3926 = vmatprep.subr.msk.bf16.mxu1 %vm4514_vm11, %v3924_v37  ;;  %v4133_v38 = vunpack.i.h.bf16 %v4131_v18  ;;  %v4132_v29 = vunpack.i.l.bf16 %v4131_v18 }
 0x8b8   : > { %v3930_v21 = vpack.c.bf16 %v4133_v38, %v4132_v29 }
 0x8b9   : > { %v4136_v39 = vpop.permute.xlu0 %4135 }
 0x8ba   : > { %v4138_v40 = vunpack.i.h.bf16 %v4136_v39  ;;  %v4137_v41 = vunpack.i.l.bf16 %v4136_v39 }
 0x8bb   : > { %3929 = vmatpush3.bf16.xpose.msk.msra.mxu1 %vm4514_vm11, %v3924_v37 }
 0x8bc   : > { %3932 = vmatprep.subr.msk.bf16.mxu1 %vm4514_vm11, %v3930_v21  ;;  %v3936_v42 = vpack.c.bf16 %v4138_v40, %v4137_v41 }
 0x8c3   : > { %3935 = vmatpush3.bf16.xpose.msk.msra.mxu1 %vm4514_vm11, %v3930_v21 }
 0x8c4   : > { %3938 = vmatprep.subr.msk.bf16.mxu1 %vm4514_vm11, %v3936_v42 }
 0x8cb   : > { %3941 = vmatpush3.bf16.xpose.msk.msra.mxu1 %vm4514_vm11, %v3936_v42 }
 0x8d2   : > { %3679 = vmatmul.mubr.msk.f32.vlgmr.msra.gmra.mrb[16].mxu1 %vm594_vm1, %v1691_v9  ;;  %v4332_v9 = vld [vmem:[#allocation2 + $0x20] sm:$0xff] }
 0x8d3   : > { %3681 = vmatprep.mubr.msk.f32.mxu1 %vm594_vm1, %v1696_v48 }
 0x8d6   : > { %3682 = vmatmul.mubr.msk.f32.gmra.mrb[18].mxu1 %vm594_vm1, %v1701_v15 }
 0x8d7   : > { %3684 = vmatprep.mubr.msk.f32.mxu1 %vm594_vm1, %v1706_v27 }
 0x8da   : > { %3685 = vmatmul.mubr.msk.f32.gmra.mrb[20].mxu1 %vm594_vm1, %v1711_v25  ;;  %v4334_v25 = vld [vmem:[#allocation2 + $0x30] sm:$0xff] }
 0x8db   : > { %3687 = vmatprep.mubr.msk.f32.mxu1 %vm594_vm1, %v1716_v61 }
 0x8de   : > { %3688 = vmatmul.mubr.msk.f32.gmra.mrb[22].mxu1 %vm594_vm1, %v1721_v28 }
 0x9a5   : > { %v3680_v34 = vpop.f32.mrb[16].mxu1 }
 0x9a6   : > { %v1894_v19 = vmul.f32 %v4327_v43, %v3680_v34  ;;  %v1846_v35 = vpop.f32.mrb[17].mxu1 }
 0x9a7   : > { %v1893_v46 = vmul.f32 %v4328_v45, %v1846_v35 }
 0x9a8   : > { %v1904_v47 = vsel %vm412_vm2, %v1894_v19, -inf }
 0x9a9   : > { %1905 = vmax.xlane.f32.xlu0 %v1904_v47  ;;  %v3683_v51 = vpop.f32.mrb[18].mxu1  ;;  %v1901_v53 = vsel %vm412_vm2, %v1893_v46, -inf }
 0x9aa   : > { %v1896_v14 = vmul.f32 %v4329_v54, %v3683_v51  ;;  %1902 = vmax.xlane.f32.xlu1 %v1901_v53  ;;  %v1856_v16 = vpop.f32.mrb[19].mxu1 }
 0x9ab   : > { %v1895_v52 = vmul.f32 %v4330_v20, %v1856_v16 }
 0x9ac   : > { %v1910_v3 = vsel %vm412_vm2, %v1896_v14, -inf }
 0x9ad   : > { %v3686_v23 = vpop.f32.mrb[20].mxu1  ;;  %v1907_v0 = vsel %vm412_vm2, %v1895_v52, -inf }
 0x9ae   : > { %v1898_v7 = vmul.f32 %v4331_v6, %v3686_v23  ;;  %1911 = vmax.xlane.f32.xlu1 %v1910_v3  ;;  %1908 = vmax.xlane.f32.xlu0 %v1907_v0  ;;  %v1866_v8 = vpop.f32.mrb[21].mxu1 }
 0x9af   : > { %v1897_v10 = vmul.f32 %v4332_v9, %v1866_v8 }
 0x9b0   : > { %v1916_v11 = vsel %vm412_vm2, %v1898_v7, -inf }
 0x9b1   : > { %v3689_v13 = vpop.f32.mrb[22].mxu1  ;;  %v1913_v15 = vsel %vm412_vm2, %v1897_v10, -inf }
 0x9b2   : > { %v1900_v48 = vmul.f32 %v4333_v17, %v3689_v13  ;;  %1917 = vmax.xlane.f32.xlu1 %v1916_v11  ;;  %1914 = vmax.xlane.f32.xlu0 %v1913_v15  ;;  %v1876_v49 = vpop.f32.mrb[23].mxu1 }
 0x9b3   : > { %v1899_v26 = vmul.f32 %v4334_v25, %v1876_v49 }
 0x9b4   : > { %v1922_v27 = vsel %vm412_vm2, %v1900_v48, -inf }
 0x9b5   : > { %v1919_v56 = vsel %vm412_vm2, %v1899_v26, -inf }
 0x9b6   : > { %1923 = vmax.xlane.f32.xlu1 %v1922_v27  ;;  %1920 = vmax.xlane.f32.xlu0 %v1919_v56 }
 0x9cc   : > { %4140 = vrot.lane.b32.xlu0 %v4867_v12, %s4346_s25 }
 0xa36   : > { %v1906_v28 = vpop.xlane.xlu0 %1905 }
 0xa37   : > { %v1926_v24 = vsub.f32 %v1894_v19, %v1906_v28  ;;  %v1903_v61 = vpop.xlane.xlu1 %1902 }
 0xa38   : > { %v1925_v50 = vsub.f32 %v1893_v46, %v1903_v61 }
 0xa39   : > { %v1935_v31 = vmul.f32 1.442695, %v1926_v24 }
 0xa3a   : > { %v1933_v1 = vmul.f32 1.442695, %v1925_v50 }
 0xa3b   : > { %4263 = vpow2.f32 %v1935_v31  ;;  %v1912_v5 = vpop.xlane.xlu1 %1911  ;;  %v1909_v32 = vpop.xlane.xlu0 %1908 }
 0xa3c   : > { %4265 = vpow2.f32 %v1933_v1  ;;  %v1928_v33 = vsub.f32 %v1896_v14, %v1912_v5  ;;  %v1927_v36 = vsub.f32 %v1895_v52, %v1909_v32 }
 0xa3e   : > { %v1939_v37 = vmul.f32 1.442695, %v1928_v33  ;;  %v1937_v18 = vmul.f32 1.442695, %v1927_v36 }
 0xa3f   : > { %v1918_v38 = vpop.xlane.xlu1 %1917  ;;  %v1915_v29 = vpop.xlane.xlu0 %1914 }
 0xa40   : > { %4267 = vpow2.f32 %v1939_v37  ;;  %v1930_v21 = vsub.f32 %v1898_v7, %v1918_v38  ;;  %v1929_v39 = vsub.f32 %v1897_v10, %v1915_v29  ;;  %v3252_v37 = vld [vmem:[%s5183_s3 + $0x60] sm:$0xff] }
 0xa41   : > { %4269 = vpow2.f32 %v1937_v18  ;;  %v3253_v18 = vld [vmem:[%s5183_s3 + $0x68] sm:$0xff] }
 0xa42   : > { %v1943_v12 = vmul.f32 1.442695, %v1930_v21  ;;  %v1941_v40 = vmul.f32 1.442695, %v1929_v39  ;;  %v3958_v29 = vpack.c.bf16 %v3253_v18, %v3252_v37  ;;  %v3254_v39 = vld [vmem:[%s5183_s3 + $0x70] sm:$0xff] }
 0xa43   : > { %v1924_v41 = vpop.xlane.xlu1 %1923  ;;  %v1921_v42 = vpop.xlane.xlu0 %1920 }
 0xa44   : > { %4271 = vpow2.f32 %v1943_v12  ;;  %v1932_v34 = vsub.f32 %v1900_v48, %v1924_v41  ;;  %v1931_v43 = vsub.f32 %v1899_v26, %v1921_v42  ;;  %v3255_v12 = vld [vmem:[%s5183_s3 + $0x78] sm:$0xff] }
 0xa45   : > { %v4916_v19 = vpop.eup %4263  ;;  %4273 = vpow2.f32 %v1941_v40  ;;  %v3962_v42 = vpack.c.bf16 %v3255_v12, %v3254_v39 }
 0xa46   : > { %v4266_v35 = vpop.eup %4265  ;;  %v1947_v45 = vmul.f32 1.442695, %v1932_v34  ;;  %v1945_v46 = vmul.f32 1.442695, %v1931_v43  ;;  %v1952_v47 = vsel %vm412_vm2, %v4916_v19, 0.0 }
 0xa47   : > { %1953 = vadd.xlane.f32.xlu1 %v1952_v47  ;;  %v4141_v51 = vpop.permute.xlu0 %4140  ;;  %v1949_v53 = vsel %vm412_vm2, %v4266_v35, 0.0 }
 0xa48   : > { %4275 = vpow2.f32 %v1947_v45  ;;  %v4143_v54 = vunpack.i.h.bf16 %v4141_v51  ;;  %v4142_v14 = vunpack.i.l.bf16 %v4141_v51  ;;  %1950 = vadd.xlane.f32.xlu0 %v1949_v53 }
 0xa49   : > { %4277 = vpow2.f32 %v1945_v46 }
 0xa4a   : > { %v4921_v16 = vpop.eup %4267  ;;  %v3942_v20 = vpack.c.bf16 %v4143_v54, %v4142_v14 }
 0xa4b   : > { %v4923_v52 = vpop.eup %4269  ;;  %v1958_v3 = vsel %vm412_vm2, %v4921_v16, 0.0 }
 0xa4c   : > { %1959 = vadd.xlane.f32.xlu1 %v1958_v3  ;;  %v1955_v23 = vsel %vm412_vm2, %v4923_v52, 0.0  ;;  %3943 = vmatprep.subr.bf16.mxu0 %v3942_v20 }
 0xa4d   : > { %1956 = vadd.xlane.f32.xlu0 %v1955_v23  ;;  %3945 = vmatpush3.bf16.msra.mxu0 %v3942_v20 }
 0xa4e   : > { %v4929_v0 = vpop.eup %4271 }
 0xa4f   : > { %v4931_v6 = vpop.eup %4273  ;;  %v1964_v7 = vsel %vm412_vm2, %v4929_v0, 0.0 }
 0xa50   : > { %1965 = vadd.xlane.f32.xlu1 %v1964_v7  ;;  %v1961_v8 = vsel %vm412_vm2, %v4931_v6, 0.0 }
 0xa51   : > { %1962 = vadd.xlane.f32.xlu0 %v1961_v8 }
 0xa52   : > { %v4937_v9 = vpop.eup %4275 }
 0xa53   : > { %v1970_v10 = vsel %vm412_vm2, %v4937_v9, 0.0  ;;  %v4941_v11 = vpop.eup %4277 }
 0xa54   : > { %1971 = vadd.xlane.f32.xlu1 %v1970_v10  ;;  %v1967_v13 = vsel %vm412_vm2, %v4941_v11, 0.0 }
 0xa58   : > { %1968 = vadd.xlane.f32.xlu1 %v1967_v13 }
 0xa67   : > { %4150 = vrot.lane.b32.xlu0 %v4875_v44, %s4346_s25 }
 0xa69   : > { %4145 = vrot.lane.b32.xlu1 %v4871_v22, %s4346_s25 }
 0xa6b   : > { %4155 = vrot.lane.b32.xlu0 %v4879_v30, %s4346_s25 }
 0xad4   : > { %v1954_v15 = vpop.xlane.xlu1 %1953 }
 0xad5   : > { %v1951_v17 = vpop.xlane.xlu0 %1950 }
 0xad6   : > { %4279 = vrcp.f32 %v1951_v17 }
 0xad7   : > { %4281 = vrcp.f32 %v1954_v15 }
 0xad9   : > { %v1960_v48 = vpop.xlane.xlu1 %1959 }
 0xada   : > { %v1957_v49 = vpop.xlane.xlu0 %1956 }
 0xadb   : > { %4283 = vrcp.f32 %v1957_v49 }
 0xadc   : > { %4285 = vrcp.f32 %v1960_v48 }
 0xadd   : > { %v1966_v25 = vpop.xlane.xlu1 %1965 }
 0xade   : > { %v1963_v26 = vpop.xlane.xlu0 %1962 }
 0xadf   : > { %4287 = vrcp.f32 %v1963_v26 }
 0xae0   : > { %v4280_v27 = vpop.eup %4279  ;;  %4289 = vrcp.f32 %v1966_v25 }
 0xae1   : > { %v1972_v56 = vpop.xlane.xlu1 %1971  ;;  %v1981_v28 = vmul.f32 %v4280_v27, %v4266_v35  ;;  %v4282_v21 = vpop.eup %4281 }
 0xae2   : > { %v4151_v24 = vpop.permute.xlu0 %4150  ;;  %v1982_v41 = vmul.f32 %v4282_v21, %v4916_v19  ;;  %v2463_v21 = vld [vmem:[#allocation2 + $0x8] sm:$0xff] }
 0xae3   : > { %3706 = vmatprep.mubr.msk.f32.mxu0 %vm412_vm2, %v1981_v28  ;;  %v4153_v50 = vunpack.i.h.bf16 %v4151_v24  ;;  %v4152_v22 = vunpack.i.l.bf16 %v4151_v24 }
 0xae5   : > { %v1969_v44 = vpop.xlane.xlu1 %1968  ;;  %v3950_v32 = vpack.c.bf16 %v4153_v50, %v4152_v22  ;;  %v4284_v40 = vpop.eup %4283 }
 0xae6   : > { %v4156_v30 = vpop.permute.xlu0 %4155  ;;  %4291 = vrcp.f32 %v1969_v44  ;;  %v4286_v34 = vpop.eup %4285  ;;  %v1983_v43 = vmul.f32 %v4284_v40, %v4923_v52 }
 0xae7   : > { %v4158_v33 = vunpack.i.h.bf16 %v4156_v30  ;;  %v4157_v36 = vunpack.i.l.bf16 %v4156_v30  ;;  %4293 = vrcp.f32 %v1972_v56  ;;  %v1984_v45 = vmul.f32 %v4286_v34, %v4921_v16  ;;  %v3257_v16 = vld [vmem:[%s5184_s4 + $0x3] ss:$0 sm:$0xff]  ;;  %v2465_v34 = vld [vmem:[#allocation2 + $0x18] sm:$0xff] }
 0xae9   : > { %v4146_v61 = vpop.permute.xlu1 %4145  ;;  %v3954_v38 = vpack.c.bf16 %v4158_v33, %v4157_v36  ;;  %v4288_v35 = vpop.eup %4287 }
 0xaea   : > { %v4148_v31 = vunpack.i.h.bf16 %v4146_v61  ;;  %v4147_v1 = vunpack.i.l.bf16 %v4146_v61  ;;  %v4290_v46 = vpop.eup %4289  ;;  %v1985_v47 = vmul.f32 %v4288_v35, %v4931_v6 }
 0xaeb   : > { %v1986_v19 = vmul.f32 %v4290_v46, %v4929_v0  ;;  %v2464_v46 = vld [vmem:[#allocation2 + $0x10] sm:$0xff] }
 0xaec   : > { %v3946_v5 = vpack.c.bf16 %v4148_v31, %v4147_v1 }
 0xaee   : > { %3947 = vmatprep.subr.bf16.mxu0 %v3946_v5 }
 0xaef   : > { %3949 = vmatpush3.bf16.msra.mxu0 %v3946_v5 }
 0xaf0   : > { %3951 = vmatprep.subr.bf16.mxu0 %v3950_v32  ;;  %v4292_v51 = vpop.eup %4291 }
 0xaf1   : > { %v4294_v53 = vpop.eup %4293  ;;  %v1987_v54 = vmul.f32 %v4292_v51, %v4941_v11 }
 0xaf2   : > { %v1988_v14 = vmul.f32 %v4294_v53, %v4937_v9  ;;  %v2467_v53 = vld [vmem:[#allocation2 + $0x28] sm:$0xff] }
 0xaf3   : > { %3953 = vmatpush3.bf16.msra.mxu0 %v3950_v32 }
 0xaf4   : > { %3955 = vmatprep.subr.bf16.mxu0 %v3954_v38 }
 0xaf7   : > { %3957 = vmatpush3.bf16.msra.mxu0 %v3954_v38 }
 0xaf8   : > { %3959 = vmatprep.subr.bf16.mxu0 %v3958_v29 }
 0xafa   : > { %3707 = vmatmul.mubr.msk.f32.vlgmr.msra.gmra.mrb[40].mxu0 %vm412_vm2, %v1982_v41 }
 0xafb   : > { %3709 = vmatprep.mubr.msk.f32.mxu0 %vm412_vm2, %v1983_v43  ;;  %3961 = vmatpush3.bf16.msra.mxu0 %v3958_v29 }
 0xafc   : > { %3963 = vmatprep.subr.bf16.mxu0 %v3962_v42 }
 0xafe   : > { %3710 = vmatmul.mubr.msk.f32.gmra.mrb[42].mxu0 %vm412_vm2, %v1984_v45 }
 0xaff   : > { %3712 = vmatprep.mubr.msk.f32.mxu0 %vm412_vm2, %v1985_v47  ;;  %3965 = vmatpush3.bf16.msra.mxu0 %v3962_v42 }
 0xb02   : > { %3713 = vmatmul.mubr.msk.f32.gmra.mrb[44].mxu0 %vm412_vm2, %v1986_v19 }
 0xb03   : > { %3715 = vmatprep.mubr.msk.f32.mxu0 %vm412_vm2, %v1987_v54 }
 0xb06   : > { %3716 = vmatmul.mubr.msk.f32.gmra.mrb[46].mxu0 %vm412_vm2, %v1988_v14 }
 0xb07   : > { %3726 = vmatprep.mubr.msk.f32.mxu0 %vm440_vm0, %v4815_v55 }
 0xb0a   : > { %3727 = vmatmul.mubr.msk.f32.vlgmr.msra.gmra.mrb[48].mxu0 %vm440_vm0, %v4821_v58 }
 0xb0b   : > { %3729 = vmatprep.mubr.msk.f32.mxu0 %vm440_vm0, %v4824_v59 }
 0xb0e   : > { %3730 = vmatmul.mubr.msk.f32.gmra.mrb[50].mxu0 %vm440_vm0, %v4831_v60 }
 0xb0f   : > { %3732 = vmatprep.mubr.msk.f32.mxu0 %vm440_vm0, %v4834_v62 }
 0xb12   : > { %3733 = vmatmul.mubr.msk.f32.gmra.mrb[52].mxu0 %vm440_vm0, %v4841_v63 }
 0xb13   : > { %3735 = vmatprep.mubr.msk.f32.mxu0 %vm440_vm0, %v4844_v2 }
 0xb16   : > { %3736 = vmatmul.mubr.msk.f32.gmra.mrb[54].mxu0 %vm440_vm0, %v4851_v4 }
 0xbcd   : > { %v3708_v55 = vpop.f32.mrb[40].mxu0 }
 0xbce   : > { %2144 = vst.msk [vmem:[#allocation3 + $0x88] sm:$0xff] %vm594_vm1, %v3708_v55  ;;  %v2103_v58 = vpop.f32.mrb[41].mxu0 }
 0xbcf   : > { %2143 = vst.msk [vmem:[#allocation3 + $0x80] sm:$0xff] %vm594_vm1, %v2103_v58  ;;  %v2466_v58 = vld [vmem:[#allocation2 + $0x20] sm:$0xff] }
 0xbd1   : > { %v3711_v59 = vpop.f32.mrb[42].mxu0 }
 0xbd2   : > { %2146 = vst.msk [vmem:[#allocation3 + $0x98] sm:$0xff] %vm594_vm1, %v3711_v59  ;;  %v2113_v60 = vpop.f32.mrb[43].mxu0 }
 0xbd3   : > { %2145 = vst.msk [vmem:[#allocation3 + $0x90] sm:$0xff] %vm594_vm1, %v2113_v60 }
 0xbd5   : > { %v3714_v62 = vpop.f32.mrb[44].mxu0 }
 0xbd6   : > { %2148 = vst.msk [vmem:[#allocation3 + $0xa8] sm:$0xff] %vm594_vm1, %v3714_v62  ;;  %v2123_v63 = vpop.f32.mrb[45].mxu0 }
 0xbd7   : > { %2147 = vst.msk [vmem:[#allocation3 + $0xa0] sm:$0xff] %vm594_vm1, %v2123_v63  ;;  %v2469_v63 = vld [vmem:[#allocation2 + $0x38] sm:$0xff] }
 0xbd9   : > { %v3717_v2 = vpop.f32.mrb[46].mxu0 }
 0xbda   : > { %2150 = vst.msk [vmem:[#allocation3 + $0xb8] sm:$0xff] %vm594_vm1, %v3717_v2  ;;  %v2133_v4 = vpop.f32.mrb[47].mxu0 }
 0xbdb   : > { %2149 = vst.msk [vmem:[#allocation3 + $0xb0] sm:$0xff] %vm594_vm1, %v2133_v4 }
 0xbdd   : > { %v3728_v20 = vpop.f32.mrb[48].mxu0 }
 0xbde   : > { %v2268_v52 = vadd.f32 %v3728_v20, %v3257_v16  ;;  %v2262_v3 = vpop.f32.mrb[49].mxu0  ;;  %v2468_v20 = vld [vmem:[#allocation2 + $0x30] sm:$0xff] }
 0xbdf   : > { %v2263_v23 = vadd.f32 %v3257_v16, %v2262_v3 }
 0xbe1   : > { %3754 = vmatprep.mubr.msk.f32.mxu1 %vm594_vm1, %v2263_v23  ;;  %v5006_v0 = vpack.i.bf16 %v2268_v52, %v2263_v23  ;;  %v3731_v6 = vpop.f32.mrb[50].mxu0 }
 0xbe2   : > { %v2278_v7 = vadd.f32 %v3731_v6, %v3257_v16  ;;  %v2272_v8 = vpop.f32.mrb[51].mxu0 }
 0xbe3   : > { %4160 = vrot.lane.b32.xlu1 %v5006_v0, %s4343_s18  ;;  %v2273_v9 = vadd.f32 %v3257_v16, %v2272_v8 }
 0xbe5   : > { %v5010_v10 = vpack.i.bf16 %v2278_v7, %v2273_v9  ;;  %v3734_v11 = vpop.f32.mrb[52].mxu0 }
 0xbe6   : > { %v2288_v13 = vadd.f32 %v3734_v11, %v3257_v16  ;;  %v2282_v15 = vpop.f32.mrb[53].mxu0 }
 0xbe7   : > { %4165 = vrot.lane.b32.xlu0 %v5010_v10, %s4343_s18  ;;  %v2283_v17 = vadd.f32 %v3257_v16, %v2282_v15 }
 0xbe9   : > { %v5014_v48 = vpack.i.bf16 %v2288_v13, %v2283_v17  ;;  %v3737_v49 = vpop.f32.mrb[54].mxu0 }
 0xbea   : > { %v2298_v25 = vadd.f32 %v3737_v49, %v3257_v16  ;;  %v2292_v26 = vpop.f32.mrb[55].mxu0 }
 0xbeb   : > { %4170 = vrot.lane.b32.xlu1 %v5014_v48, %s4343_s18  ;;  %v2293_v27 = vadd.f32 %v3257_v16, %v2292_v26 }
 0xbed   : > { %v5018_v56 = vpack.i.bf16 %v2298_v25, %v2293_v27 }
 0xbef   : > { %4175 = vrot.lane.b32.xlu0 %v5018_v56, %s4343_s18  ;;  %s4347_s18 = smov 8  }
 0xc55   : > { %v4161_v28 = vpop.permute.xlu1 %4160 }
 0xc56   : > { %v4163_v24 = vunpack.i.h.bf16 %v4161_v28  ;;  %v4162_v44 = vunpack.i.l.bf16 %v4161_v28 }
 0xc58   : > { %v3966_v61 = vpack.c.bf16 %v4163_v24, %v4162_v44 }
 0xc59   : > { %v4166_v50 = vpop.permute.xlu0 %4165 }
 0xc5a   : > { %3968 = vmatprep.subr.msk.bf16.mxu1 %vm4514_vm11, %v3966_v61  ;;  %v4168_v22 = vunpack.i.h.bf16 %v4166_v50  ;;  %v4167_v31 = vunpack.i.l.bf16 %v4166_v50 }
 0xc5b   : > { %3971 = vmatpush3.bf16.xpose.msk.msra.mxu1 %vm4514_vm11, %v3966_v61 }
 0xc5c   : > { %v3972_v1 = vpack.c.bf16 %v4168_v22, %v4167_v31 }
 0xc5d   : > { %v4171_v30 = vpop.permute.xlu1 %4170 }
 0xc5e   : > { %3974 = vmatprep.subr.msk.bf16.mxu1 %vm4514_vm11, %v3972_v1  ;;  %v4173_v5 = vunpack.i.h.bf16 %v4171_v30  ;;  %v4172_v32 = vunpack.i.l.bf16 %v4171_v30 }
 0xc60   : > { %v3978_v33 = vpack.c.bf16 %v4173_v5, %v4172_v32 }
 0xc61   : > { %v4176_v36 = vpop.permute.xlu0 %4175 }
 0xc62   : > { %v4178_v37 = vunpack.i.h.bf16 %v4176_v36  ;;  %v4177_v18 = vunpack.i.l.bf16 %v4176_v36 }
 0xc63   : > { %3977 = vmatpush3.bf16.xpose.msk.msra.mxu1 %vm4514_vm11, %v3972_v1 }
 0xc64   : > { %3980 = vmatprep.subr.msk.bf16.mxu1 %vm4514_vm11, %v3978_v33  ;;  %v3984_v38 = vpack.c.bf16 %v4178_v37, %v4177_v18 }
 0xc6b   : > { %3983 = vmatpush3.bf16.xpose.msk.msra.mxu1 %vm4514_vm11, %v3978_v33 }
 0xc6c   : > { %3986 = vmatprep.subr.msk.bf16.mxu1 %vm4514_vm11, %v3984_v38 }
 0xc73   : > { %3989 = vmatpush3.bf16.xpose.msk.msra.mxu1 %vm4514_vm11, %v3984_v38  ;;  %vm2784_vm11 = vcmask 130112  }
 0xc7a   : > { %3755 = vmatmul.mubr.msk.f32.vlgmr.msra.gmra.mrb[24].mxu1 %vm594_vm1, %v2268_v52 }
 0xc7b   : > { %3757 = vmatprep.mubr.msk.f32.mxu1 %vm594_vm1, %v2273_v9 }
 0xc7e   : > { %3758 = vmatmul.mubr.msk.f32.gmra.mrb[26].mxu1 %vm594_vm1, %v2278_v7 }
 0xc7f   : > { %3760 = vmatprep.mubr.msk.f32.mxu1 %vm594_vm1, %v2283_v17 }
 0xc82   : > { %3761 = vmatmul.mubr.msk.f32.gmra.mrb[28].mxu1 %vm594_vm1, %v2288_v13 }
 0xc83   : > { %3763 = vmatprep.mubr.msk.f32.mxu1 %vm594_vm1, %v2293_v27 }
 0xc86   : > { %3764 = vmatmul.mubr.msk.f32.gmra.mrb[30].mxu1 %vm594_vm1, %v2298_v25 }
 0xd4d   : > { %v3756_v29 = vpop.f32.mrb[24].mxu1 }
 0xd4e   : > { %v2471_v39 = vmul.f32 %v3756_v29, %v2463_v21  ;;  %v2423_v12 = vpop.f32.mrb[25].mxu1 }
 0xd4f   : > { %v2470_v40 = vmul.f32 %v2462_v57, %v2423_v12 }
 0xd50   : > { %v2481_v41 = vsel %vm412_vm2, %v2471_v39, -inf }
 0xd51   : > { %2482 = vmax.xlane.f32.xlu0 %v2481_v41  ;;  %v3759_v42 = vpop.f32.mrb[26].mxu1  ;;  %v2478_v43 = vsel %vm412_vm2, %v2470_v40, -inf }
 0xd52   : > { %v2473_v35 = vmul.f32 %v3759_v42, %v2465_v34  ;;  %2479 = vmax.xlane.f32.xlu1 %v2478_v43  ;;  %v2433_v45 = vpop.f32.mrb[27].mxu1 }
 0xd53   : > { %v2472_v47 = vmul.f32 %v2464_v46, %v2433_v45 }
 0xd54   : > { %v2487_v51 = vsel %vm412_vm2, %v2473_v35, -inf }
 0xd55   : > { %v3762_v19 = vpop.f32.mrb[28].mxu1  ;;  %v2484_v54 = vsel %vm412_vm2, %v2472_v47, -inf }
 0xd56   : > { %v2475_v14 = vmul.f32 %v3762_v19, %v2467_v53  ;;  %2488 = vmax.xlane.f32.xlu1 %v2487_v51  ;;  %2485 = vmax.xlane.f32.xlu0 %v2484_v54  ;;  %v2443_v55 = vpop.f32.mrb[29].mxu1  ;;  %v2744_v19 = vld [vmem:[#allocation3 + $0x40] sm:$0xff]  ;;  %v2745_v53 = vld [vmem:[#allocation3 + $0x48] sm:$0xff] }
 0xd57   : > { %v2474_v59 = vmul.f32 %v2466_v58, %v2443_v55  ;;  %v2793_v54 = vld [vmem:[#allocation3 + $0x80] sm:$0xff]  ;;  %v2746_v55 = vld [vmem:[#allocation3 + $0x50] sm:$0xff]  ;;  %v2747_v58 = vld [vmem:[#allocation3 + $0x58] sm:$0xff] }
 0xd58   : > { %v2493_v60 = vsel %vm412_vm2, %v2475_v14, -inf }
 0xd59   : > { %v3765_v62 = vpop.f32.mrb[30].mxu1  ;;  %v2490_v2 = vsel %vm412_vm2, %v2474_v59, -inf }
 0xd5a   : > { %v2477_v4 = vmul.f32 %v3765_v62, %v2469_v63  ;;  %2494 = vmax.xlane.f32.xlu1 %v2493_v60  ;;  %2491 = vmax.xlane.f32.xlu0 %v2490_v2  ;;  %v2453_v16 = vpop.f32.mrb[31].mxu1  ;;  %v2797_v60 = vld [vmem:[#allocation3 + $0xa0] sm:$0xff]  ;;  %v2798_v62 = vld [vmem:[#allocation3 + $0xa8] sm:$0xff]  ;;  %v2750_v63 = vld [vmem:[#allocation3 + $0x70] sm:$0xff] }
 0xd5b   : > { %v2476_v52 = vmul.f32 %v2468_v20, %v2453_v16  ;;  %v2751_v2 = vld [vmem:[#allocation3 + $0x78] sm:$0xff] }
 0xd5c   : > { %v2499_v3 = vsel %vm412_vm2, %v2477_v4, -inf  ;;  %v2800_v16 = vld [vmem:[#allocation3 + $0xb8] sm:$0xff] }
 0xd5d   : > { %v2496_v23 = vsel %vm412_vm2, %v2476_v52, -inf }
 0xd5e   : > { %2500 = vmax.xlane.f32.xlu1 %v2499_v3  ;;  %2497 = vmax.xlane.f32.xlu0 %v2496_v23 }
 0xd74   : > { %4180 = vrot.lane.b32.xlu0 %v5006_v0, %s4346_s25 }
 0xdde   : > { %v2483_v6 = vpop.xlane.xlu0 %2482 }
 0xddf   : > { %v2503_v7 = vsub.f32 %v2471_v39, %v2483_v6  ;;  %v2480_v8 = vpop.xlane.xlu1 %2479 }
 0xde0   : > { %v2502_v9 = vsub.f32 %v2470_v40, %v2480_v8 }
 0xde1   : > { %v2512_v11 = vmul.f32 1.442695, %v2503_v7 }
 0xde2   : > { %v2510_v13 = vmul.f32 1.442695, %v2502_v9 }
 0xde3   : > { %4295 = vpow2.f32 %v2512_v11  ;;  %v2489_v15 = vpop.xlane.xlu1 %2488  ;;  %v2486_v17 = vpop.xlane.xlu0 %2485 }
 0xde4   : > { %4297 = vpow2.f32 %v2510_v13  ;;  %v2505_v49 = vsub.f32 %v2473_v35, %v2489_v15  ;;  %v2504_v25 = vsub.f32 %v2472_v47, %v2486_v17 }
 0xde6   : > { %v2516_v26 = vmul.f32 1.442695, %v2505_v49  ;;  %v2514_v27 = vmul.f32 1.442695, %v2504_v25 }
 0xde7   : > { %v2495_v28 = vpop.xlane.xlu1 %2494  ;;  %v2492_v24 = vpop.xlane.xlu0 %2491 }
 0xde8   : > { %4299 = vpow2.f32 %v2516_v26  ;;  %v2507_v44 = vsub.f32 %v2475_v14, %v2495_v28  ;;  %v2506_v61 = vsub.f32 %v2474_v59, %v2492_v24  ;;  %v2794_v14 = vld [vmem:[#allocation3 + $0x88] sm:$0xff]  ;;  %v2748_v59 = vld [vmem:[#allocation3 + $0x60] sm:$0xff] }
 0xde9   : > { %4301 = vpow2.f32 %v2514_v27 }
 0xdea   : > { %v2520_v0 = vmul.f32 1.442695, %v2507_v44  ;;  %v2518_v50 = vmul.f32 1.442695, %v2506_v61 }
 0xdeb   : > { %v2501_v22 = vpop.xlane.xlu1 %2500  ;;  %v2498_v31 = vpop.xlane.xlu0 %2497 }
 0xdec   : > { %4303 = vpow2.f32 %v2520_v0  ;;  %v2509_v1 = vsub.f32 %v2477_v4, %v2501_v22  ;;  %v2508_v30 = vsub.f32 %v2476_v52, %v2498_v31  ;;  %v2799_v4 = vld [vmem:[#allocation3 + $0xb0] sm:$0xff] }
 0xded   : > { %v5055_v5 = vpop.eup %4295  ;;  %4305 = vpow2.f32 %v2518_v50 }
 0xdee   : > { %v5057_v32 = vpop.eup %4297  ;;  %v2524_v33 = vmul.f32 1.442695, %v2509_v1  ;;  %v2522_v36 = vmul.f32 1.442695, %v2508_v30  ;;  %v2529_v37 = vsel %vm412_vm2, %v5055_v5, 0.0 }
 0xdef   : > { %2530 = vadd.xlane.f32.xlu1 %v2529_v37  ;;  %v4181_v18 = vpop.permute.xlu0 %4180  ;;  %v2526_v38 = vsel %vm412_vm2, %v5057_v32, 0.0 }
 0xdf0   : > { %4307 = vpow2.f32 %v2524_v33  ;;  %v4183_v29 = vunpack.i.h.bf16 %v4181_v18  ;;  %v4182_v21 = vunpack.i.l.bf16 %v4181_v18  ;;  %2527 = vadd.xlane.f32.xlu0 %v2526_v38 }
 0xdf1   : > { %4309 = vpow2.f32 %v2522_v36 }
 0xdf2   : > { %v5063_v39 = vpop.eup %4299  ;;  %v3990_v12 = vpack.c.bf16 %v4183_v29, %v4182_v21 }
 0xdf3   : > { %v5065_v57 = vpop.eup %4301  ;;  %v2535_v40 = vsel %vm412_vm2, %v5063_v39, 0.0 }
 0xdf4   : > { %2536 = vadd.xlane.f32.xlu1 %v2535_v40  ;;  %v2532_v41 = vsel %vm412_vm2, %v5065_v57, 0.0  ;;  %3991 = vmatprep.subr.bf16.mxu0 %v3990_v12 }
 0xdf5   : > { %2533 = vadd.xlane.f32.xlu0 %v2532_v41  ;;  %4014 = vmatprep.subr.bf16.mxu1 %v3990_v12 }
 0xdf6   : > { %v5071_v42 = vpop.eup %4303  ;;  %3993 = vmatpush3.bf16.msra.mxu0 %v3990_v12  ;;  %4018 = vmatpush3.bf16.msra.mxu1 %v3990_v12 }
 0xdf7   : > { %v5073_v34 = vpop.eup %4305  ;;  %v2541_v43 = vsel %vm412_vm2, %v5071_v42, 0.0 }
 0xdf8   : > { %2542 = vadd.xlane.f32.xlu1 %v2541_v43  ;;  %v2538_v35 = vsel %vm412_vm2, %v5073_v34, 0.0 }
 0xdf9   : > { %2539 = vadd.xlane.f32.xlu0 %v2538_v35 }
 0xdfa   : > { %v5079_v45 = vpop.eup %4307 }
 0xdfb   : > { %v2547_v46 = vsel %vm412_vm2, %v5079_v45, 0.0  ;;  %v5083_v47 = vpop.eup %4309 }
 0xdfc   : > { %2548 = vadd.xlane.f32.xlu1 %v2547_v46  ;;  %v2544_v51 = vsel %vm412_vm2, %v5083_v47, 0.0 }
 0xe00   : > { %2545 = vadd.xlane.f32.xlu1 %v2544_v51 }
 0xe0f   : > { %4190 = vrot.lane.b32.xlu0 %v5014_v48, %s4346_s25  ;;  %v2795_v48 = vld [vmem:[#allocation3 + $0x90] sm:$0xff] }
 0xe11   : > { %4185 = vrot.lane.b32.xlu1 %v5010_v10, %s4346_s25  ;;  %v2796_v10 = vld [vmem:[#allocation3 + $0x98] sm:$0xff] }
 0xe13   : > { %4195 = vrot.lane.b32.xlu0 %v5018_v56, %s4346_s25  ;;  %v2749_v56 = vld [vmem:[#allocation3 + $0x68] sm:$0xff] }
 0xe15   : > { %2760 = vrot.lane.b32.xlu1 %v2744_v19, %s4347_s18 }
 0xe17   : > { %2762 = vrot.lane.b32.xlu0 %v2745_v53, %s4347_s18 }
 0xe19   : > { %2809 = vrot.lane.b32.xlu1 %v2793_v54, %s4348_s21 }
 0xe1b   : > { %2811 = vrot.lane.b32.xlu0 %v2794_v14, %s4348_s21 }
 0xe1d   : > { %2764 = vrot.lane.b32.xlu1 %v2746_v55, %s4347_s18 }
 0xe1f   : > { %2766 = vrot.lane.b32.xlu0 %v2747_v58, %s4347_s18  ;;  %v2900_v58 = vld [vmem:[%s5185_s5 + $0x8] sm:$0xff] }
 0xe21   : > { %2813 = vrot.lane.b32.xlu1 %v2795_v48, %s4348_s21 }
 0xe23   : > { %2815 = vrot.lane.b32.xlu0 %v2796_v10, %s4348_s21 }
 0xe25   : > { %2768 = vrot.lane.b32.xlu1 %v2748_v59, %s4347_s18 }
 0xe27   : > { %2770 = vrot.lane.b32.xlu0 %v2749_v56, %s4347_s18  ;;  %v2901_v56 = vld [vmem:[%s5185_s5 + $0x10] sm:$0xff] }
 0xe29   : > { %2817 = vrot.lane.b32.xlu1 %v2797_v60, %s4348_s21  ;;  %v2902_v60 = vld [vmem:[%s5185_s5 + $0x18] sm:$0xff] }
 0xe2b   : > { %2819 = vrot.lane.b32.xlu0 %v2798_v62, %s4348_s21 }
 0xe2d   : > { %2772 = vrot.lane.b32.xlu1 %v2750_v63, %s4347_s18 }
 0xe2f   : > { %2774 = vrot.lane.b32.xlu0 %v2751_v2, %s4347_s18  ;;  %v4010_v2 = vpack.c.bf16 %v2902_v60, %v2901_v56 }
 0xe31   : > { %2821 = vrot.lane.b32.xlu1 %v2799_v4, %s4348_s21 }
 0xe33   : > { %2823 = vrot.lane.b32.xlu0 %v2800_v16, %s4348_s21 }
 0xe7c   : > { %v2531_v20 = vpop.xlane.xlu1 %2530 }
 0xe7d   : > { %v2528_v52 = vpop.xlane.xlu0 %2527 }
 0xe7e   : > { %4311 = vrcp.f32 %v2528_v52 }
 0xe81   : > { %v2537_v3 = vpop.xlane.xlu1 %2536 }
 0xe82   : > { %v2534_v23 = vpop.xlane.xlu0 %2533 }
 0xe85   : > { %v2543_v6 = vpop.xlane.xlu1 %2542 }
 0xe86   : > { %v2540_v7 = vpop.xlane.xlu0 %2539 }
 0xe88   : > { %v4312_v8 = vpop.eup %4311 }
 0xe89   : > { %v2549_v9 = vpop.xlane.xlu1 %2548  ;;  %v2558_v11 = vmul.f32 %v4312_v8, %v5057_v32 }
 0xe8a   : > { %v4191_v13 = vpop.permute.xlu0 %4190 }
 0xe8b   : > { %3782 = vmatprep.mubr.msk.f32.mxu0 %vm412_vm2, %v2558_v11  ;;  %v4193_v25 = vunpack.i.h.bf16 %v4191_v13  ;;  %v4192_v26 = vunpack.i.l.bf16 %v4191_v13 }
 0xe8d   : > { %v2546_v15 = vpop.xlane.xlu1 %2545  ;;  %v3998_v0 = vpack.c.bf16 %v4193_v25, %v4192_v26 }
 0xe8e   : > { %4313 = vrcp.f32 %v2546_v15  ;;  %v4196_v17 = vpop.permute.xlu0 %4195 }
 0xe8f   : > { %4315 = vrcp.f32 %v2531_v20  ;;  %v4198_v50 = vunpack.i.h.bf16 %v4196_v17  ;;  %v4197_v22 = vunpack.i.l.bf16 %v4196_v17 }
 0xe90   : > { %4317 = vrcp.f32 %v2549_v9 }
 0xe91   : > { %v4186_v49 = vpop.permute.xlu1 %4185  ;;  %4319 = vrcp.f32 %v2534_v23  ;;  %v4002_v33 = vpack.c.bf16 %v4198_v50, %v4197_v22 }
 0xe92   : > { %v4188_v27 = vunpack.i.h.bf16 %v4186_v49  ;;  %v4187_v28 = vunpack.i.l.bf16 %v4186_v49  ;;  %v2763_v24 = vpop.permute.xlu0 %2762  ;;  %4321 = vrcp.f32 %v2537_v3 }
 0xe93   : > { %2786 = vst.msk [vmem:[#allocation4 + $0x8] sm:$0xff] %vm2784_vm11, %v2763_v24  ;;  %4323 = vrcp.f32 %v2540_v7 }
 0xe94   : > { %v3994_v44 = vpack.c.bf16 %v4188_v27, %v4187_v28  ;;  %4325 = vrcp.f32 %v2543_v6 }
 0xe95   : > { %v2761_v61 = vpop.permute.xlu1 %2760 }
 0xe96   : > { %2785 = vst.msk [vmem:[#allocation4] sm:$0xff] %vm2784_vm11, %v2761_v61  ;;  %v2812_v31 = vpop.permute.xlu0 %2811  ;;  %3995 = vmatprep.subr.bf16.mxu0 %v3994_v44  ;;  %4015 = vmatprep.subr.bf16.mxu1 %v3994_v44 }
 0xe97   : > { %2835 = vst.msk [vmem:[#allocation4 + $0x8] sm:$0xff] %vm2833_vm12, %v2812_v31  ;;  %3997 = vmatpush3.bf16.msra.mxu0 %v3994_v44  ;;  %4019 = vmatpush3.bf16.msra.mxu1 %v3994_v44 }
 0xe98   : > { %v4314_v1 = vpop.eup %4313  ;;  %3999 = vmatprep.subr.bf16.mxu0 %v3998_v0  ;;  %4016 = vmatprep.subr.bf16.mxu1 %v3998_v0 }
 0xe99   : > { %v2810_v30 = vpop.permute.xlu1 %2809  ;;  %v2564_v32 = vmul.f32 %v4314_v1, %v5083_v47  ;;  %v4316_v37 = vpop.eup %4315 }
 0xe9a   : > { %2834 = vst.msk [vmem:[#allocation4] sm:$0xff] %vm2833_vm12, %v2810_v30  ;;  %v2767_v36 = vpop.permute.xlu0 %2766  ;;  %v4318_v18 = vpop.eup %4317  ;;  %v2559_v12 = vmul.f32 %v4316_v37, %v5055_v5 }
 0xe9b   : > { %2788 = vst.msk [vmem:[#allocation4 + $0x18] sm:$0xff] %vm2784_vm11, %v2767_v36  ;;  %4001 = vmatpush3.bf16.msra.mxu0 %v3998_v0  ;;  %4020 = vmatpush3.bf16.msra.mxu1 %v3998_v0  ;;  %v4320_v29 = vpop.eup %4319  ;;  %v2565_v40 = vmul.f32 %v4318_v18, %v5079_v45 }
 0xe9c   : > { %3791 = vmatprep.mubr.msk.f32.mxu1 %vm412_vm2, %v2564_v32  ;;  %4003 = vmatprep.subr.bf16.mxu0 %v4002_v33  ;;  %v4322_v41 = vpop.eup %4321  ;;  %v2560_v35 = vmul.f32 %v4320_v29, %v5065_v57  ;;  %v3290_v32 = vld [vmem:[%s5186_s6] ss:$0 sm:$0xff] }
 0xe9d   : > { %4017 = vmatprep.subr.bf16.mxu1 %v4002_v33  ;;  %v2765_v38 = vpop.permute.xlu1 %2764  ;;  %v4324_v46 = vpop.eup %4323  ;;  %v2561_v5 = vmul.f32 %v4322_v41, %v5063_v39 }
 0xe9e   : > { %2787 = vst.msk [vmem:[#allocation4 + $0x10] sm:$0xff] %vm2784_vm11, %v2765_v38  ;;  %v2816_v21 = vpop.permute.xlu0 %2815  ;;  %v4326_v51 = vpop.eup %4325  ;;  %v2562_v19 = vmul.f32 %v4324_v46, %v5073_v34 }
 0xe9f   : > { %2837 = vst.msk [vmem:[#allocation4 + $0x18] sm:$0xff] %vm2833_vm12, %v2816_v21  ;;  %4005 = vmatpush3.bf16.msra.mxu0 %v4002_v33  ;;  %4021 = vmatpush3.bf16.msra.mxu1 %v4002_v33  ;;  %v2563_v53 = vmul.f32 %v4326_v51, %v5071_v42  ;;  %v2899_v42 = vld [vmem:[%s5185_s5] sm:$0xff] }
 0xea0   : > { %v4006_v48 = vpack.c.bf16 %v2900_v58, %v2899_v42 }
 0xea1   : > { %v2814_v43 = vpop.permute.xlu1 %2813 }
 0xea2   : > { %2836 = vst.msk [vmem:[#allocation4 + $0x10] sm:$0xff] %vm2833_vm12, %v2814_v43  ;;  %v2771_v47 = vpop.permute.xlu0 %2770  ;;  %3783 = vmatmul.mubr.msk.f32.vlgmr.msra.gmra.mrb[56].mxu0 %vm412_vm2, %v2559_v12  ;;  %3792 = vmatmul.mubr.msk.f32.vlgmr.msra.gmra.mrb[32].mxu1 %vm412_vm2, %v2565_v40 }
 0xea3   : > { %2790 = vst.msk [vmem:[#allocation4 + $0x28] sm:$0xff] %vm2784_vm11, %v2771_v47  ;;  %3785 = vmatprep.mubr.msk.f32.mxu0 %vm412_vm2, %v2560_v35  ;;  %4007 = vmatprep.subr.bf16.mxu0 %v4006_v48 }
 0xea4   : > { %4009 = vmatpush3.bf16.msra.mxu0 %v4006_v48 }
 0xea5   : > { %v2769_v45 = vpop.permute.xlu1 %2768  ;;  %4011 = vmatprep.subr.bf16.mxu0 %v4010_v2 }
 0xea6   : > { %2789 = vst.msk [vmem:[#allocation4 + $0x20] sm:$0xff] %vm2784_vm11, %v2769_v45  ;;  %v2820_v57 = vpop.permute.xlu0 %2819  ;;  %3786 = vmatmul.mubr.msk.f32.gmra.mrb[58].mxu0 %vm412_vm2, %v2561_v5 }
 0xea7   : > { %2839 = vst.msk [vmem:[#allocation4 + $0x28] sm:$0xff] %vm2833_vm12, %v2820_v57  ;;  %3788 = vmatprep.mubr.msk.f32.mxu0 %vm412_vm2, %v2562_v19 }
 0xea8   : > { %4013 = vmatpush3.bf16.msra.mxu0 %v4010_v2 }
 0xea9   : > { %v2818_v54 = vpop.permute.xlu1 %2817 }
 0xeaa   : > { %2838 = vst.msk [vmem:[#allocation4 + $0x20] sm:$0xff] %vm2833_vm12, %v2818_v54  ;;  %v2775_v14 = vpop.permute.xlu0 %2774  ;;  %3789 = vmatmul.mubr.msk.f32.gmra.mrb[60].mxu0 %vm412_vm2, %v2563_v53  ;;  %vm2882_vm2 = vcmask 261312  }
 0xeab   : > { %2792 = vst.msk [vmem:[#allocation4 + $0x38] sm:$0xff] %vm2784_vm11, %v2775_v14 }
 0xead   : > { %v2773_v39 = vpop.permute.xlu1 %2772 }
 0xeae   : > { %v2824_v34 = vpop.permute.xlu0 %2823  ;;  %2791 = vst.msk [vmem:[#allocation4 + $0x30] sm:$0xff] %vm2784_vm11, %v2773_v39 }
 0xeaf   : > { %2841 = vst.msk [vmem:[#allocation4 + $0x38] sm:$0xff] %vm2833_vm12, %v2824_v34 }
 0xeb1   : > { %v2822_v55 = vpop.permute.xlu1 %2821 }
 0xeb2   : > { %2840 = vst.msk [vmem:[#allocation4 + $0x30] sm:$0xff] %vm2833_vm12, %v2822_v55 }
 0xf75   : > { %v3784_v10 = vpop.f32.mrb[56].mxu0  ;;  %v3793_v59 = vpop.f32.mrb[32].mxu1 }
 0xf76   : > { %2721 = vst.msk [vmem:[#allocation3 + $0xc8] sm:$0xff] %vm594_vm1, %v3784_v10  ;;  %2727 = vst.msk [vmem:[#allocation3 + $0xf8] sm:$0xff] %vm594_vm1, %v3793_v59  ;;  %v2680_v62 = vpop.f32.mrb[57].mxu0  ;;  %v2710_v63 = vpop.f32.mrb[33].mxu1 }
 0xf77   : > { %2720 = vst.msk [vmem:[#allocation3 + $0xc0] sm:$0xff] %vm594_vm1, %v2680_v62  ;;  %2726 = vst.msk [vmem:[#allocation3 + $0xf0] sm:$0xff] %vm594_vm1, %v2710_v63 }
 0xf79   : > { %v3787_v4 = vpop.f32.mrb[58].mxu0 }
 0xf7a   : > { %2723 = vst.msk [vmem:[#allocation3 + $0xd8] sm:$0xff] %vm594_vm1, %v3787_v4  ;;  %v2690_v16 = vpop.f32.mrb[59].mxu0 }
 0xf7b   : > { %2722 = vst.msk [vmem:[#allocation3 + $0xd0] sm:$0xff] %vm594_vm1, %v2690_v16 }
 0xf7d   : > { %v3790_v20 = vpop.f32.mrb[60].mxu0  ;;  %v2843_v52 = vld [vmem:[#allocation3 + $0xc8] sm:$0xff]  ;;  %v2849_v11 = vld [vmem:[#allocation3 + $0xf8] sm:$0xff] }
 0xf7e   : > { %2725 = vst.msk [vmem:[#allocation3 + $0xe8] sm:$0xff] %vm594_vm1, %v3790_v20  ;;  %2860 = vrot.lane.b32.xlu0 %v2843_v52, %s4349_s30  ;;  %v2700_v3 = vpop.f32.mrb[61].mxu0  ;;  %v2842_v23 = vld [vmem:[#allocation3 + $0xc0] sm:$0xff]  ;;  %v2848_v13 = vld [vmem:[#allocation3 + $0xf0] sm:$0xff] }
 0xf7f   : > { %2724 = vst.msk [vmem:[#allocation3 + $0xe0] sm:$0xff] %vm594_vm1, %v2700_v3  ;;  %2858 = vrot.lane.b32.xlu1 %v2842_v23, %s4349_s30 }
 0xf81   : > { %v2845_v6 = vld [vmem:[#allocation3 + $0xd8] sm:$0xff] }
 0xf82   : > { %2864 = vrot.lane.b32.xlu0 %v2845_v6, %s4349_s30  ;;  %v2844_v7 = vld [vmem:[#allocation3 + $0xd0] sm:$0xff] }
 0xf83   : > { %2862 = vrot.lane.b32.xlu1 %v2844_v7, %s4349_s30 }
 0xf85   : > { %v2847_v8 = vld [vmem:[#allocation3 + $0xe8] sm:$0xff] }
 0xf86   : > { %2868 = vrot.lane.b32.xlu0 %v2847_v8, %s4349_s30  ;;  %v2846_v9 = vld [vmem:[#allocation3 + $0xe0] sm:$0xff] }
 0xf87   : > { %2866 = vrot.lane.b32.xlu1 %v2846_v9, %s4349_s30 }
 0xf8a   : > { %2872 = vrot.lane.b32.xlu0 %v2849_v11, %s4349_s30 }
 0xf8b   : > { %2870 = vrot.lane.b32.xlu1 %v2848_v13, %s4349_s30 }
 0xff0   : > { %v2861_v15 = vpop.permute.xlu0 %2860 }
 0xff1   : > { %2884 = vst.msk [vmem:[#allocation4 + $0x8] sm:$0xff] %vm2882_vm2, %v2861_v15  ;;  %v2859_v17 = vpop.permute.xlu1 %2858 }
 0xff2   : > { %2883 = vst.msk [vmem:[#allocation4] sm:$0xff] %vm2882_vm2, %v2859_v17 }
 0xff4   : > { %v2865_v49 = vpop.permute.xlu0 %2864 }
 0xff5   : > { %2886 = vst.msk [vmem:[#allocation4 + $0x18] sm:$0xff] %vm2882_vm2, %v2865_v49  ;;  %v2863_v25 = vpop.permute.xlu1 %2862 }
 0xff6   : > { %2885 = vst.msk [vmem:[#allocation4 + $0x10] sm:$0xff] %vm2882_vm2, %v2863_v25 }
 0xff8   : > { %v2869_v26 = vpop.permute.xlu0 %2868  ;;  %v2892_v24 = vld [vmem:[#allocation4 + $0x8] sm:$0xff] }
 0xff9   : > { %2888 = vst.msk [vmem:[#allocation4 + $0x28] sm:$0xff] %vm2882_vm2, %v2869_v26  ;;  %v2867_v27 = vpop.permute.xlu1 %2866  ;;  %v2891_v28 = vld [vmem:[#allocation4] sm:$0xff] }
 0xffa   : > { %2887 = vst.msk [vmem:[#allocation4 + $0x20] sm:$0xff] %vm2882_vm2, %v2867_v27  ;;  %3802 = vmatprep.mubr.msk.f32.mxu0 %vm440_vm0, %v2891_v28 }
 0xffb   : > { %3803 = vmatmul.mubr.msk.f32.vlgmr.msra.gmra.mrb[62].mxu0 %vm440_vm0, %v2892_v24 }
 0xffc   : > { %v2873_v44 = vpop.permute.xlu0 %2872  ;;  %v2894_v50 = vld [vmem:[#allocation4 + $0x18] sm:$0xff] }
 0xffd   : > { %2890 = vst.msk [vmem:[#allocation4 + $0x38] sm:$0xff] %vm2882_vm2, %v2873_v44  ;;  %v2871_v61 = vpop.permute.xlu1 %2870  ;;  %v2893_v0 = vld [vmem:[#allocation4 + $0x10] sm:$0xff] }
 0xffe   : > { %2889 = vst.msk [vmem:[#allocation4 + $0x30] sm:$0xff] %vm2882_vm2, %v2871_v61  ;;  %3805 = vmatprep.mubr.msk.f32.mxu0 %vm440_vm0, %v2893_v0 }
 0xfff   : > { %3806 = vmatmul.mubr.msk.f32.gmra.mrb[64].mxu0 %vm440_vm0, %v2894_v50 }
0x1000   : > { %v2896_v31 = vld [vmem:[#allocation4 + $0x28] sm:$0xff] }
0x1001   : > { %v2895_v22 = vld [vmem:[#allocation4 + $0x20] sm:$0xff] }
0x1002   : > { %3808 = vmatprep.mubr.msk.f32.mxu0 %vm440_vm0, %v2895_v22 }
0x1003   : > { %3809 = vmatmul.mubr.msk.f32.gmra.mrb[66].mxu0 %vm440_vm0, %v2896_v31 }
0x1004   : > { %v2898_v30 = vld [vmem:[#allocation4 + $0x38] sm:$0xff] }
0x1005   : > { %v2897_v1 = vld [vmem:[#allocation4 + $0x30] sm:$0xff] }
0x1006   : > { %3811 = vmatprep.mubr.msk.f32.mxu0 %vm440_vm0, %v2897_v1 }
0x1007   : > { %3812 = vmatmul.mubr.msk.f32.gmra.mrb[68].mxu0 %vm440_vm0, %v2898_v30 }
0x10ce   : > { %v3804_v33 = vpop.f32.mrb[62].mxu0 }
0x10cf   : > { %v3006_v36 = vadd.f32 %v3804_v33, %v3290_v32  ;;  %v3000_v37 = vpop.f32.mrb[63].mxu0 }
0x10d0   : > { %v3001_v18 = vadd.f32 %v3290_v32, %v3000_v37 }
0x10d1   : > { %3040 = vst.msk [vmem:[%s314_s14 + $0x8] sm:$0xff] %vm440_vm0, %v3006_v36 }
0x10d2   : > { %3039 = vst.msk [vmem:[%s314_s14] sm:$0xff] %vm440_vm0, %v3001_v18  ;;  %v3807_v38 = vpop.f32.mrb[64].mxu0 }
0x10d3   : > { %v3016_v29 = vadd.f32 %v3807_v38, %v3290_v32  ;;  %v3010_v21 = vpop.f32.mrb[65].mxu0 }
0x10d4   : > { %v3011_v12 = vadd.f32 %v3290_v32, %v3010_v21 }
0x10d5   : > { %3042 = vst.msk [vmem:[%s314_s14 + $0x18] sm:$0xff] %vm440_vm0, %v3016_v29 }
0x10d6   : > { %3041 = vst.msk [vmem:[%s314_s14 + $0x10] sm:$0xff] %vm440_vm0, %v3011_v12  ;;  %v3810_v40 = vpop.f32.mrb[66].mxu0 }
0x10d7   : > { %v3026_v41 = vadd.f32 %v3810_v40, %v3290_v32  ;;  %v3020_v43 = vpop.f32.mrb[67].mxu0 }
0x10d8   : > { %v3021_v35 = vadd.f32 %v3290_v32, %v3020_v43 }
0x10d9   : > { %3044 = vst.msk [vmem:[%s314_s14 + $0x28] sm:$0xff] %vm440_vm0, %v3026_v41 }
0x10da   : > { %3043 = vst.msk [vmem:[%s314_s14 + $0x20] sm:$0xff] %vm440_vm0, %v3021_v35  ;;  %v3813_v46 = vpop.f32.mrb[68].mxu0 }
0x10db   : > { %v3036_v47 = vadd.f32 %v3813_v46, %v3290_v32  ;;  %v3030_v5 = vpop.f32.mrb[69].mxu0 }
0x10dc   : > { %v3031_v51 = vadd.f32 %v3290_v32, %v3030_v5 }
0x10dd   : > { %3046 = vst.msk [vmem:[%s314_s14 + $0x38] sm:$0xff] %vm440_vm0, %v3036_v47 }
0x10de   : > { %3045 = vst.msk [vmem:[%s314_s14 + $0x30] sm:$0xff] %vm440_vm0, %v3031_v51 }
0x10df PF: > { %s17_s24 = sadd.s32 1, %s4341_s24  }
0x10e0   : > { %p14_p5 = scmp.ge.s32.totalorder %s17_s24, 4  }
0x10e2   :  { %16 = sbr.rel (!%p14_p5) target bundleno = 1 (0x1), region = 93 }

</bundles_post_ra>
